<compile_context>
chip_gen: v7x
topology: tpu7x:2x2x1
jax: 0.10.0
libtpu: 0.0.40
codegen_flags: <defaults>
</compile_context>

<pallas_src>
import jax
import jax.numpy as jnp
from jax.experimental import pallas as pl
from jax.experimental.pallas import tpu as pltpu


def lstm_kernel(x_ref, h0_ref, c0_ref, wih_ref, whh_hbm, b_ref, wd_hbm, bd_ref,
                logits_ref, h_out_ref, c_out_ref,
                gates_sc, hall_sc, whh_vmem, wd_vmem, dma_sem):
    B, H = h0_ref.shape
    TB = x_ref.shape[0]
    T = TB // B

    # ---- Kick off weight DMAs so they hide behind Phase 1 / the recurrence ----
    whh_cp = pltpu.make_async_copy(whh_hbm, whh_vmem, dma_sem.at[0])
    wd_cp = pltpu.make_async_copy(wd_hbm, wd_vmem, dma_sem.at[1])
    whh_cp.start()
    wd_cp.start()

    # ---- Phase 1: input projection for ALL timesteps (one MXU matmul) ----
    # gates_in = x @ W_ih^T + (b_ih + b_hh)   -> staged in VMEM scratch (f32).
    gates_sc[...] = jnp.dot(x_ref[...], wih_ref[...],
                            preferred_element_type=jnp.float32) + b_ref[...]

    # W_hh must be resident before the recurrence starts.
    whh_cp.wait()

    # ---- Phase 2: recurrence — only h @ W_hh^T is on the serial chain ----
    h = h0_ref[...]                                      # (B, H) f32 carry
    c = c0_ref[...]                                      # (B, H) f32 carry
    for t in range(T):                                   # static T -> fully unrolled
        gates = (gates_sc[pl.ds(t * B, B), :]
                 + jnp.dot(h.astype(jnp.bfloat16), whh_vmem[...],
                           preferred_element_type=jnp.float32))      # (B, 4H)
        # gate order (host-permuted): i, f, o, g  -> one sigmoid over (B, 3H)
        sig = jax.nn.sigmoid(gates[:, 0:3 * H])
        i_g = sig[:, 0 * H:1 * H]
        f_g = sig[:, 1 * H:2 * H]
        o_g = sig[:, 2 * H:3 * H]
        g_g = jnp.tanh(gates[:, 3 * H:4 * H])
        c = f_g * c + i_g * g_g
        h = o_g * jnp.tanh(c)
        hall_sc[pl.ds(t * B, B), :] = h                  # f32 slab, aligned store

    # Final states written exactly once.
    h_out_ref[...] = h.astype(h_out_ref.dtype)
    c_out_ref[...] = c.astype(c_out_ref.dtype)

    # W_d must be resident before the vocab projection.
    wd_cp.wait()

    # ---- Phase 3: vocab projection batched over all timesteps ----
    logits = jnp.dot(hall_sc[...].astype(jnp.bfloat16), wd_vmem[...],
                     preferred_element_type=jnp.float32) + bd_ref[...]
    logits_ref[...] = logits.astype(logits_ref.dtype)    # single lane-dense store


def prepare_params(params):
    """One-time weight prep: gate permutation (i,f,g,o)->(i,f,o,g) and bf16 casts.

    Called once outside the per-step forward so the wrapper does no weight-side
    XLA work per call.
    """
    def perm_gates(w):
        i, f, g, o = jnp.split(w, 4, axis=-1)
        return jnp.concatenate([i, f, o, g], axis=-1)

    return {
        "emb_bf": params["emb"].astype(jnp.bfloat16),               # (V, D)
        "wih_bf": perm_gates(params["w_ih_t"]).astype(jnp.bfloat16),  # (D, 4H)
        "whh_bf": perm_gates(params["w_hh_t"]).astype(jnp.bfloat16),  # (H, 4H)
        "bias":   perm_gates(params["bias"]).astype(jnp.float32),     # (1, 4H)
        "wd_bf":  params["w_d_t"].astype(jnp.bfloat16),               # (H, V)
        "b_d":    params["b_d"].astype(jnp.float32),                  # (1, V)
    }


def lstm_forward(x_tokens, prev_state, prepped):
    """x_tokens: (B, T) int32; prev_state: (h0, c0) each (1, B, H)."""
    B, T = x_tokens.shape
    V, D = prepped["emb_bf"].shape
    H = prepped["whh_bf"].shape[0]

    # Single time-major gather on the pre-cast bf16 table (no separate
    # transpose / cast of the gathered activations).
    # TODO(synk): could be pulled in-kernel via scalar-prefetched token ids +
    # in-kernel jnp.take on a VMEM emb table; kept in the wrapper for robustness.
    flat_idx = jnp.transpose(x_tokens).reshape(-1)                 # (T*B,)
    x_tm = jnp.take(prepped["emb_bf"], flat_idx, axis=0)           # (T*B, D) bf16

    h0 = prev_state[0][0]  # (B, H)
    c0 = prev_state[1][0]  # (B, H)

    grid_spec = pltpu.PrefetchScalarGridSpec(
        num_scalar_prefetch=0,
        grid=(1,),
        in_specs=[
            pl.BlockSpec((T * B, D), lambda i: (0, 0)),      # x (time-major flat)
            pl.BlockSpec((B, H), lambda i: (0, 0)),          # h0
            pl.BlockSpec((B, H), lambda i: (0, 0)),          # c0
            pl.BlockSpec((D, 4 * H), lambda i: (0, 0)),      # W_ih^T (bf16)
            pl.BlockSpec(memory_space=pl.ANY),               # W_hh^T (HBM, manual DMA)
            pl.BlockSpec((1, 4 * H), lambda i: (0, 0)),      # bias (f32)
            pl.BlockSpec(memory_space=pl.ANY),               # W_d^T (HBM, manual DMA)
            pl.BlockSpec((1, V), lambda i: (0, 0)),          # b_d (f32)
        ],
        out_specs=[
            pl.BlockSpec((T * B, V), lambda i: (0, 0)),      # logits (time-major flat)
            pl.BlockSpec((B, H), lambda i: (0, 0)),          # h_n
            pl.BlockSpec((B, H), lambda i: (0, 0)),          # c_n
        ],
        scratch_shapes=[
            pltpu.VMEM((T * B, 4 * H), jnp.float32),         # staged input gates
            pltpu.VMEM((T * B, H), jnp.float32),             # h slab (all steps, f32)
            pltpu.VMEM((H, 4 * H), jnp.bfloat16),            # W_hh^T VMEM buffer
            pltpu.VMEM((H, V), jnp.bfloat16),                # W_d^T VMEM buffer
            pltpu.SemaphoreType.DMA((2,)),                   # whh / wd copy sems
        ],
    )

    logits_flat, h_n, c_n = pl.pallas_call(
        lstm_kernel,
        out_shape=(
            jax.ShapeDtypeStruct((T * B, V), jnp.float32),
            jax.ShapeDtypeStruct((B, H), jnp.float32),
            jax.ShapeDtypeStruct((B, H), jnp.float32),
        ),
        grid_spec=grid_spec,
    )(x_tm, h0, c0, prepped["wih_bf"], prepped["whh_bf"], prepped["bias"],
      prepped["wd_bf"], prepped["b_d"])

    # Back to batch_first (B, T, V), matching PyTorch.
    logits = logits_flat.reshape(T, B, V).transpose(1, 0, 2)
    return logits, (h_n[None, :, :], c_n[None, :, :])


def lstm_reference(x_tokens, prev_state, params):
    """Pure-JAX f32 reference matching PyTorch nn.LSTM semantics (gate order i,f,g,o)."""
    emb = jnp.take(params["emb"], x_tokens, axis=0)  # (B, T, D)
    h = prev_state[0][0]
    c = prev_state[1][0]
    H = h.shape[1]
    outs = []
    for t in range(x_tokens.shape[1]):
        gates = emb[:, t, :] @ params["w_ih_t"] + h @ params["w_hh_t"] + params["bias"]
        i = jax.nn.sigmoid(gates[:, 0 * H:1 * H])
        f = jax.nn.sigmoid(gates[:, 1 * H:2 * H])
        g = jnp.tanh(gates[:, 2 * H:3 * H])
        o = jax.nn.sigmoid(gates[:, 3 * H:4 * H])
        c = f * c + i * g
        h = o * jnp.tanh(c)
        outs.append(h @ params["w_d_t"] + params["b_d"])
    logits = jnp.stack(outs, axis=1)
    return logits, (h[None], c[None])


if __name__ == "__main__":
    # Small shapes consistent with the module: vocab/output_size V, input_size D,
    # hidden_size H, batch B, sequence length T.
    B, T = 8, 8
    D, H, V = 128, 128, 256   # input_size=128, hidden_size=128, output_size=256

    key = jax.random.PRNGKey(0)
    ks = jax.random.split(key, 8)
    scale = 0.1
    params = {
        "emb":    scale * jax.random.normal(ks[0], (V, D), jnp.float32),
        "w_ih_t": scale * jax.random.normal(ks[1], (D, 4 * H), jnp.float32),
        "w_hh_t": scale * jax.random.normal(ks[2], (H, 4 * H), jnp.float32),
        "bias":   scale * jax.random.normal(ks[3], (1, 4 * H), jnp.float32),
        "w_d_t":  scale * jax.random.normal(ks[4], (H, V), jnp.float32),
        "b_d":    scale * jax.random.normal(ks[5], (1, V), jnp.float32),
    }

    x_tokens = jax.random.randint(ks[6], (B, T), 0, V, dtype=jnp.int32)
    # zero_state(batch_size) -> (1, B, H) zeros for both h and c
    prev_state = (jnp.zeros((1, B, H), jnp.float32),
                  jnp.zeros((1, B, H), jnp.float32))

    prepped = prepare_params(params)   # one-time weight prep (permute + bf16)

    logits, (h_n, c_n) = lstm_forward(x_tokens, prev_state, prepped)
    jax.block_until_ready((logits, h_n, c_n))

    # Correctness check against pure-JAX f32 reference (kernel uses bf16 weights).
    ref_logits, (ref_h, ref_c) = lstm_reference(x_tokens, prev_state, params)
    assert logits.shape == (B, T, V) and h_n.shape == (1, B, H) and c_n.shape == (1, B, H)
    assert jnp.allclose(logits, ref_logits, rtol=2e-2, atol=2e-2)
    assert jnp.allclose(h_n, ref_h, rtol=2e-2, atol=2e-2)
    assert jnp.allclose(c_n, ref_c, rtol=2e-2, atol=2e-2)

    print("KERNEL_OK")
</pallas_src>

<mosaic_0001>
module attributes {stable_mosaic.version = 11 : i64} {
  func.func @lstm_kernel(%arg0: i32, %arg1: memref<64x128xbf16, #tpu.memory_space<vmem>>, %arg2: memref<8x128xf32, #tpu.memory_space<vmem>>, %arg3: memref<8x128xf32, #tpu.memory_space<vmem>>, %arg4: memref<128x512xbf16, #tpu.memory_space<vmem>>, %arg5: memref<128x512xbf16, #tpu.memory_space<any>>, %arg6: memref<1x512xf32, #tpu.memory_space<vmem>>, %arg7: memref<128x256xbf16, #tpu.memory_space<any>>, %arg8: memref<1x256xf32, #tpu.memory_space<vmem>>, %arg9: memref<64x256xf32, #tpu.memory_space<vmem>>, %arg10: memref<8x128xf32, #tpu.memory_space<vmem>>, %arg11: memref<8x128xf32, #tpu.memory_space<vmem>>, %arg12: memref<64x512xf32, #tpu.memory_space<vmem>>, %arg13: memref<64x128xf32, #tpu.memory_space<vmem>>, %arg14: memref<128x512xbf16, #tpu.memory_space<vmem>>, %arg15: memref<128x256xbf16, #tpu.memory_space<vmem>>, %arg16: memref<2x!tpu.dma_semaphore, #tpu.memory_space<semaphore_mem>>) attributes {dimension_semantics = [#tpu.dimension_semantics<arbitrary>], iteration_bounds = array<i64: 1>, scalar_prefetch = 0 : i64, scratch_operands = 5 : i64, tpu.core_type = #tpu.core_type<tc>, window_params = [{pipeline_mode = #tpu.pipeline_mode<synchronous>, transform_indices = @transform_0, window_bounds = array<i64: 64, 128>}, {pipeline_mode = #tpu.pipeline_mode<synchronous>, transform_indices = @transform_1, window_bounds = array<i64: 8, 128>}, {pipeline_mode = #tpu.pipeline_mode<synchronous>, transform_indices = @transform_2, window_bounds = array<i64: 8, 128>}, {pipeline_mode = #tpu.pipeline_mode<synchronous>, transform_indices = @transform_3, window_bounds = array<i64: 128, 512>}, {}, {pipeline_mode = #tpu.pipeline_mode<synchronous>, transform_indices = @transform_5, window_bounds = array<i64: 1, 512>}, {}, {pipeline_mode = #tpu.pipeline_mode<synchronous>, transform_indices = @transform_7, window_bounds = array<i64: 1, 256>}, {pipeline_mode = #tpu.pipeline_mode<synchronous>, transform_indices = @transform_8, window_bounds = array<i64: 64, 256>}, {pipeline_mode = #tpu.pipeline_mode<synchronous>, transform_indices = @transform_9, window_bounds = array<i64: 8, 128>}, {pipeline_mode = #tpu.pipeline_mode<synchronous>, transform_indices = @transform_10, window_bounds = array<i64: 8, 128>}]} {
    %c0_i32 = arith.constant 0 : i32
    %0 = tpu.memref_slice %arg16[%c0_i32] : memref<2x!tpu.dma_semaphore, #tpu.memory_space<semaphore_mem>> -> memref<1x!tpu.dma_semaphore, #tpu.memory_space<semaphore_mem>>
    %1 = tpu.memref_squeeze %0 : memref<1x!tpu.dma_semaphore, #tpu.memory_space<semaphore_mem>> -> memref<!tpu.dma_semaphore, #tpu.memory_space<semaphore_mem>>
    tpu.enqueue_dma source(%arg5 : memref<128x512xbf16, #tpu.memory_space<any>>) target(%arg14 : memref<128x512xbf16, #tpu.memory_space<vmem>>) target_semaphore(%1 : memref<!tpu.dma_semaphore, #tpu.memory_space<semaphore_mem>>)
    %c1_i32 = arith.constant 1 : i32
    %2 = tpu.memref_slice %arg16[%c1_i32] : memref<2x!tpu.dma_semaphore, #tpu.memory_space<semaphore_mem>> -> memref<1x!tpu.dma_semaphore, #tpu.memory_space<semaphore_mem>>
    %3 = tpu.memref_squeeze %2 : memref<1x!tpu.dma_semaphore, #tpu.memory_space<semaphore_mem>> -> memref<!tpu.dma_semaphore, #tpu.memory_space<semaphore_mem>>
    tpu.enqueue_dma source(%arg7 : memref<128x256xbf16, #tpu.memory_space<any>>) target(%arg15 : memref<128x256xbf16, #tpu.memory_space<vmem>>) target_semaphore(%3 : memref<!tpu.dma_semaphore, #tpu.memory_space<semaphore_mem>>)
    %c0 = arith.constant 0 : index
    %c0_0 = arith.constant 0 : index
    %4 = vector.load %arg1[%c0, %c0_0] : memref<64x128xbf16, #tpu.memory_space<vmem>>, vector<64x128xbf16>
    %c0_1 = arith.constant 0 : index
    %c0_2 = arith.constant 0 : index
    %5 = vector.load %arg4[%c0_1, %c0_2] : memref<128x512xbf16, #tpu.memory_space<vmem>>, vector<128x512xbf16>
    %cst = arith.constant dense<0.000000e+00> : vector<64x512xf32>
    %6 = tpu.matmul %4, %5, %cst {dimension_numbers = #tpu.dot_dimension_numbers<[1], [0], [0], [1], [0, 0, 1, 1], [], []>} : vector<64x128xbf16>, vector<128x512xbf16>, vector<64x512xf32> -> vector<64x512xf32>
    %c0_3 = arith.constant 0 : index
    %c0_4 = arith.constant 0 : index
    %7 = vector.load %arg6[%c0_3, %c0_4] : memref<1x512xf32, #tpu.memory_space<vmem>>, vector<1x512xf32>
    %8 = vector.broadcast %7 : vector<1x512xf32> to vector<64x512xf32>
    %9 = arith.addf %6, %8 : vector<64x512xf32>
    %c0_5 = arith.constant 0 : index
    %c0_6 = arith.constant 0 : index
    %10 = vector.load %arg12[%c0_5, %c0_6] : memref<64x512xf32, #tpu.memory_space<vmem>>, vector<64x512xf32>
    tpu.vector_store %arg12[%c0_5, %c0_6], %9 {strides = array<i32>} : memref<64x512xf32, #tpu.memory_space<vmem>>, vector<64x512xf32>,
    %c0_i32_7 = arith.constant 0 : i32
    %11 = tpu.memref_slice %arg16[%c0_i32_7] : memref<2x!tpu.dma_semaphore, #tpu.memory_space<semaphore_mem>> -> memref<1x!tpu.dma_semaphore, #tpu.memory_space<semaphore_mem>>
    %12 = tpu.memref_squeeze %11 : memref<1x!tpu.dma_semaphore, #tpu.memory_space<semaphore_mem>> -> memref<!tpu.dma_semaphore, #tpu.memory_space<semaphore_mem>>
    tpu.wait_dma2 semaphore(%12 : memref<!tpu.dma_semaphore, #tpu.memory_space<semaphore_mem>>) src(%arg5 : memref<128x512xbf16, #tpu.memory_space<any>>) dst(%arg14 : memref<128x512xbf16, #tpu.memory_space<vmem>>)
    %c0_8 = arith.constant 0 : index
    %c0_9 = arith.constant 0 : index
    %13 = vector.load %arg2[%c0_8, %c0_9] : memref<8x128xf32, #tpu.memory_space<vmem>>, vector<8x128xf32>
    %c0_10 = arith.constant 0 : index
    %c0_11 = arith.constant 0 : index
    %14 = vector.load %arg3[%c0_10, %c0_11] : memref<8x128xf32, #tpu.memory_space<vmem>>, vector<8x128xf32>
    %c0_12 = arith.constant 0 : index
    %c0_13 = arith.constant 0 : index
    %15 = vector.load %arg12[%c0_12, %c0_13] : memref<64x512xf32, #tpu.memory_space<vmem>>, vector<8x512xf32>
    %16 = arith.truncf %13 : vector<8x128xf32> to vector<8x128xbf16>
    %c0_14 = arith.constant 0 : index
    %c0_15 = arith.constant 0 : index
    %17 = vector.load %arg14[%c0_14, %c0_15] : memref<128x512xbf16, #tpu.memory_space<vmem>>, vector<128x512xbf16>
    %cst_16 = arith.constant dense<0.000000e+00> : vector<8x512xf32>
    %18 = tpu.matmul %16, %17, %cst_16 {dimension_numbers = #tpu.dot_dimension_numbers<[1], [0], [0], [1], [0, 0, 1, 1], [], []>} : vector<8x128xbf16>, vector<128x512xbf16>, vector<8x512xf32> -> vector<8x512xf32>
    %19 = arith.addf %15, %18 : vector<8x512xf32>
    %20 = vector.extract_strided_slice %19 {offsets = [0, 0], sizes = [8, 384], strides = [1, 1]} : vector<8x512xf32> to vector<8x384xf32>
    %21 = arith.negf %20 : vector<8x384xf32>
    %22 = math.exp %21 : vector<8x384xf32>
    %cst_17 = arith.constant 1.000000e+00 : f32
    %23 = vector.broadcast %cst_17 : f32 to vector<8x384xf32>
    %24 = arith.addf %23, %22 : vector<8x384xf32>
    %25 = arith.divf %23, %24 : vector<8x384xf32>
    %26 = vector.extract_strided_slice %25 {offsets = [0, 0], sizes = [8, 128], strides = [1, 1]} : vector<8x384xf32> to vector<8x128xf32>
    %27 = vector.extract_strided_slice %25 {offsets = [0, 128], sizes = [8, 128], strides = [1, 1]} : vector<8x384xf32> to vector<8x128xf32>
    %28 = vector.extract_strided_slice %25 {offsets = [0, 256], sizes = [8, 128], strides = [1, 1]} : vector<8x384xf32> to vector<8x128xf32>
    %29 = vector.extract_strided_slice %19 {offsets = [0, 384], sizes = [8, 128], strides = [1, 1]} : vector<8x512xf32> to vector<8x128xf32>
    %30 = math.tanh %29 : vector<8x128xf32>
    %31 = arith.mulf %27, %14 : vector<8x128xf32>
    %32 = arith.mulf %26, %30 : vector<8x128xf32>
    %33 = arith.addf %31, %32 : vector<8x128xf32>
    %34 = math.tanh %33 : vector<8x128xf32>
    %35 = arith.mulf %28, %34 : vector<8x128xf32>
    %c0_18 = arith.constant 0 : index
    %c0_19 = arith.constant 0 : index
    %36 = vector.load %arg13[%c0_18, %c0_19] : memref<64x128xf32, #tpu.memory_space<vmem>>, vector<8x128xf32>
    tpu.vector_store %arg13[%c0_18, %c0_19], %35 {strides = array<i32>} : memref<64x128xf32, #tpu.memory_space<vmem>>, vector<8x128xf32>,
    %c8 = arith.constant 8 : index
    %c0_20 = arith.constant 0 : index
    %37 = vector.load %arg12[%c8, %c0_20] : memref<64x512xf32, #tpu.memory_space<vmem>>, vector<8x512xf32>
    %38 = arith.truncf %35 : vector<8x128xf32> to vector<8x128xbf16>
    %c0_21 = arith.constant 0 : index
    %c0_22 = arith.constant 0 : index
    %39 = vector.load %arg14[%c0_21, %c0_22] : memref<128x512xbf16, #tpu.memory_space<vmem>>, vector<128x512xbf16>
    %cst_23 = arith.constant dense<0.000000e+00> : vector<8x512xf32>
    %40 = tpu.matmul %38, %39, %cst_23 {dimension_numbers = #tpu.dot_dimension_numbers<[1], [0], [0], [1], [0, 0, 1, 1], [], []>} : vector<8x128xbf16>, vector<128x512xbf16>, vector<8x512xf32> -> vector<8x512xf32>
    %41 = arith.addf %37, %40 : vector<8x512xf32>
    %42 = vector.extract_strided_slice %41 {offsets = [0, 0], sizes = [8, 384], strides = [1, 1]} : vector<8x512xf32> to vector<8x384xf32>
    %43 = arith.negf %42 : vector<8x384xf32>
    %44 = math.exp %43 : vector<8x384xf32>
    %cst_24 = arith.constant 1.000000e+00 : f32
    %45 = vector.broadcast %cst_24 : f32 to vector<8x384xf32>
    %46 = arith.addf %45, %44 : vector<8x384xf32>
    %47 = arith.divf %45, %46 : vector<8x384xf32>
    %48 = vector.extract_strided_slice %47 {offsets = [0, 0], sizes = [8, 128], strides = [1, 1]} : vector<8x384xf32> to vector<8x128xf32>
    %49 = vector.extract_strided_slice %47 {offsets = [0, 128], sizes = [8, 128], strides = [1, 1]} : vector<8x384xf32> to vector<8x128xf32>
    %50 = vector.extract_strided_slice %47 {offsets = [0, 256], sizes = [8, 128], strides = [1, 1]} : vector<8x384xf32> to vector<8x128xf32>
    %51 = vector.extract_strided_slice %41 {offsets = [0, 384], sizes = [8, 128], strides = [1, 1]} : vector<8x512xf32> to vector<8x128xf32>
    %52 = math.tanh %51 : vector<8x128xf32>
    %53 = arith.mulf %49, %33 : vector<8x128xf32>
    %54 = arith.mulf %48, %52 : vector<8x128xf32>
    %55 = arith.addf %53, %54 : vector<8x128xf32>
    %56 = math.tanh %55 : vector<8x128xf32>
    %57 = arith.mulf %50, %56 : vector<8x128xf32>
    %c8_25 = arith.constant 8 : index
    %c0_26 = arith.constant 0 : index
    %58 = vector.load %arg13[%c8_25, %c0_26] : memref<64x128xf32, #tpu.memory_space<vmem>>, vector<8x128xf32>
    tpu.vector_store %arg13[%c8_25, %c0_26], %57 {strides = array<i32>} : memref<64x128xf32, #tpu.memory_space<vmem>>, vector<8x128xf32>,
    %c16 = arith.constant 16 : index
    %c0_27 = arith.constant 0 : index
    %59 = vector.load %arg12[%c16, %c0_27] : memref<64x512xf32, #tpu.memory_space<vmem>>, vector<8x512xf32>
    %60 = arith.truncf %57 : vector<8x128xf32> to vector<8x128xbf16>
    %c0_28 = arith.constant 0 : index
    %c0_29 = arith.constant 0 : index
    %61 = vector.load %arg14[%c0_28, %c0_29] : memref<128x512xbf16, #tpu.memory_space<vmem>>, vector<128x512xbf16>
    %cst_30 = arith.constant dense<0.000000e+00> : vector<8x512xf32>
    %62 = tpu.matmul %60, %61, %cst_30 {dimension_numbers = #tpu.dot_dimension_numbers<[1], [0], [0], [1], [0, 0, 1, 1], [], []>} : vector<8x128xbf16>, vector<128x512xbf16>, vector<8x512xf32> -> vector<8x512xf32>
    %63 = arith.addf %59, %62 : vector<8x512xf32>
    %64 = vector.extract_strided_slice %63 {offsets = [0, 0], sizes = [8, 384], strides = [1, 1]} : vector<8x512xf32> to vector<8x384xf32>
    %65 = arith.negf %64 : vector<8x384xf32>
    %66 = math.exp %65 : vector<8x384xf32>
    %cst_31 = arith.constant 1.000000e+00 : f32
    %67 = vector.broadcast %cst_31 : f32 to vector<8x384xf32>
    %68 = arith.addf %67, %66 : vector<8x384xf32>
    %69 = arith.divf %67, %68 : vector<8x384xf32>
    %70 = vector.extract_strided_slice %69 {offsets = [0, 0], sizes = [8, 128], strides = [1, 1]} : vector<8x384xf32> to vector<8x128xf32>
    %71 = vector.extract_strided_slice %69 {offsets = [0, 128], sizes = [8, 128], strides = [1, 1]} : vector<8x384xf32> to vector<8x128xf32>
    %72 = vector.extract_strided_slice %69 {offsets = [0, 256], sizes = [8, 128], strides = [1, 1]} : vector<8x384xf32> to vector<8x128xf32>
    %73 = vector.extract_strided_slice %63 {offsets = [0, 384], sizes = [8, 128], strides = [1, 1]} : vector<8x512xf32> to vector<8x128xf32>
    %74 = math.tanh %73 : vector<8x128xf32>
    %75 = arith.mulf %71, %55 : vector<8x128xf32>
    %76 = arith.mulf %70, %74 : vector<8x128xf32>
    %77 = arith.addf %75, %76 : vector<8x128xf32>
    %78 = math.tanh %77 : vector<8x128xf32>
    %79 = arith.mulf %72, %78 : vector<8x128xf32>
    %c16_32 = arith.constant 16 : index
    %c0_33 = arith.constant 0 : index
    %80 = vector.load %arg13[%c16_32, %c0_33] : memref<64x128xf32, #tpu.memory_space<vmem>>, vector<8x128xf32>
    tpu.vector_store %arg13[%c16_32, %c0_33], %79 {strides = array<i32>} : memref<64x128xf32, #tpu.memory_space<vmem>>, vector<8x128xf32>,
    %c24 = arith.constant 24 : index
    %c0_34 = arith.constant 0 : index
    %81 = vector.load %arg12[%c24, %c0_34] : memref<64x512xf32, #tpu.memory_space<vmem>>, vector<8x512xf32>
    %82 = arith.truncf %79 : vector<8x128xf32> to vector<8x128xbf16>
    %c0_35 = arith.constant 0 : index
    %c0_36 = arith.constant 0 : index
    %83 = vector.load %arg14[%c0_35, %c0_36] : memref<128x512xbf16, #tpu.memory_space<vmem>>, vector<128x512xbf16>
    %cst_37 = arith.constant dense<0.000000e+00> : vector<8x512xf32>
    %84 = tpu.matmul %82, %83, %cst_37 {dimension_numbers = #tpu.dot_dimension_numbers<[1], [0], [0], [1], [0, 0, 1, 1], [], []>} : vector<8x128xbf16>, vector<128x512xbf16>, vector<8x512xf32> -> vector<8x512xf32>
    %85 = arith.addf %81, %84 : vector<8x512xf32>
    %86 = vector.extract_strided_slice %85 {offsets = [0, 0], sizes = [8, 384], strides = [1, 1]} : vector<8x512xf32> to vector<8x384xf32>
    %87 = arith.negf %86 : vector<8x384xf32>
    %88 = math.exp %87 : vector<8x384xf32>
    %cst_38 = arith.constant 1.000000e+00 : f32
    %89 = vector.broadcast %cst_38 : f32 to vector<8x384xf32>
    %90 = arith.addf %89, %88 : vector<8x384xf32>
    %91 = arith.divf %89, %90 : vector<8x384xf32>
    %92 = vector.extract_strided_slice %91 {offsets = [0, 0], sizes = [8, 128], strides = [1, 1]} : vector<8x384xf32> to vector<8x128xf32>
    %93 = vector.extract_strided_slice %91 {offsets = [0, 128], sizes = [8, 128], strides = [1, 1]} : vector<8x384xf32> to vector<8x128xf32>
    %94 = vector.extract_strided_slice %91 {offsets = [0, 256], sizes = [8, 128], strides = [1, 1]} : vector<8x384xf32> to vector<8x128xf32>
    %95 = vector.extract_strided_slice %85 {offsets = [0, 384], sizes = [8, 128], strides = [1, 1]} : vector<8x512xf32> to vector<8x128xf32>
    %96 = math.tanh %95 : vector<8x128xf32>
    %97 = arith.mulf %93, %77 : vector<8x128xf32>
    %98 = arith.mulf %92, %96 : vector<8x128xf32>
    %99 = arith.addf %97, %98 : vector<8x128xf32>
    %100 = math.tanh %99 : vector<8x128xf32>
    %101 = arith.mulf %94, %100 : vector<8x128xf32>
    %c24_39 = arith.constant 24 : index
    %c0_40 = arith.constant 0 : index
    %102 = vector.load %arg13[%c24_39, %c0_40] : memref<64x128xf32, #tpu.memory_space<vmem>>, vector<8x128xf32>
    tpu.vector_store %arg13[%c24_39, %c0_40], %101 {strides = array<i32>} : memref<64x128xf32, #tpu.memory_space<vmem>>, vector<8x128xf32>,
    %c32 = arith.constant 32 : index
    %c0_41 = arith.constant 0 : index
    %103 = vector.load %arg12[%c32, %c0_41] : memref<64x512xf32, #tpu.memory_space<vmem>>, vector<8x512xf32>
    %104 = arith.truncf %101 : vector<8x128xf32> to vector<8x128xbf16>
    %c0_42 = arith.constant 0 : index
    %c0_43 = arith.constant 0 : index
    %105 = vector.load %arg14[%c0_42, %c0_43] : memref<128x512xbf16, #tpu.memory_space<vmem>>, vector<128x512xbf16>
    %cst_44 = arith.constant dense<0.000000e+00> : vector<8x512xf32>
    %106 = tpu.matmul %104, %105, %cst_44 {dimension_numbers = #tpu.dot_dimension_numbers<[1], [0], [0], [1], [0, 0, 1, 1], [], []>} : vector<8x128xbf16>, vector<128x512xbf16>, vector<8x512xf32> -> vector<8x512xf32>
    %107 = arith.addf %103, %106 : vector<8x512xf32>
    %108 = vector.extract_strided_slice %107 {offsets = [0, 0], sizes = [8, 384], strides = [1, 1]} : vector<8x512xf32> to vector<8x384xf32>
    %109 = arith.negf %108 : vector<8x384xf32>
    %110 = math.exp %109 : vector<8x384xf32>
    %cst_45 = arith.constant 1.000000e+00 : f32
    %111 = vector.broadcast %cst_45 : f32 to vector<8x384xf32>
    %112 = arith.addf %111, %110 : vector<8x384xf32>
    %113 = arith.divf %111, %112 : vector<8x384xf32>
    %114 = vector.extract_strided_slice %113 {offsets = [0, 0], sizes = [8, 128], strides = [1, 1]} : vector<8x384xf32> to vector<8x128xf32>
    %115 = vector.extract_strided_slice %113 {offsets = [0, 128], sizes = [8, 128], strides = [1, 1]} : vector<8x384xf32> to vector<8x128xf32>
    %116 = vector.extract_strided_slice %113 {offsets = [0, 256], sizes = [8, 128], strides = [1, 1]} : vector<8x384xf32> to vector<8x128xf32>
    %117 = vector.extract_strided_slice %107 {offsets = [0, 384], sizes = [8, 128], strides = [1, 1]} : vector<8x512xf32> to vector<8x128xf32>
    %118 = math.tanh %117 : vector<8x128xf32>
    %119 = arith.mulf %115, %99 : vector<8x128xf32>
    %120 = arith.mulf %114, %118 : vector<8x128xf32>
    %121 = arith.addf %119, %120 : vector<8x128xf32>
    %122 = math.tanh %121 : vector<8x128xf32>
    %123 = arith.mulf %116, %122 : vector<8x128xf32>
    %c32_46 = arith.constant 32 : index
    %c0_47 = arith.constant 0 : index
    %124 = vector.load %arg13[%c32_46, %c0_47] : memref<64x128xf32, #tpu.memory_space<vmem>>, vector<8x128xf32>
    tpu.vector_store %arg13[%c32_46, %c0_47], %123 {strides = array<i32>} : memref<64x128xf32, #tpu.memory_space<vmem>>, vector<8x128xf32>,
    %c40 = arith.constant 40 : index
    %c0_48 = arith.constant 0 : index
    %125 = vector.load %arg12[%c40, %c0_48] : memref<64x512xf32, #tpu.memory_space<vmem>>, vector<8x512xf32>
    %126 = arith.truncf %123 : vector<8x128xf32> to vector<8x128xbf16>
    %c0_49 = arith.constant 0 : index
    %c0_50 = arith.constant 0 : index
    %127 = vector.load %arg14[%c0_49, %c0_50] : memref<128x512xbf16, #tpu.memory_space<vmem>>, vector<128x512xbf16>
    %cst_51 = arith.constant dense<0.000000e+00> : vector<8x512xf32>
    %128 = tpu.matmul %126, %127, %cst_51 {dimension_numbers = #tpu.dot_dimension_numbers<[1], [0], [0], [1], [0, 0, 1, 1], [], []>} : vector<8x128xbf16>, vector<128x512xbf16>, vector<8x512xf32> -> vector<8x512xf32>
    %129 = arith.addf %125, %128 : vector<8x512xf32>
    %130 = vector.extract_strided_slice %129 {offsets = [0, 0], sizes = [8, 384], strides = [1, 1]} : vector<8x512xf32> to vector<8x384xf32>
    %131 = arith.negf %130 : vector<8x384xf32>
    %132 = math.exp %131 : vector<8x384xf32>
    %cst_52 = arith.constant 1.000000e+00 : f32
    %133 = vector.broadcast %cst_52 : f32 to vector<8x384xf32>
    %134 = arith.addf %133, %132 : vector<8x384xf32>
    %135 = arith.divf %133, %134 : vector<8x384xf32>
    %136 = vector.extract_strided_slice %135 {offsets = [0, 0], sizes = [8, 128], strides = [1, 1]} : vector<8x384xf32> to vector<8x128xf32>
    %137 = vector.extract_strided_slice %135 {offsets = [0, 128], sizes = [8, 128], strides = [1, 1]} : vector<8x384xf32> to vector<8x128xf32>
    %138 = vector.extract_strided_slice %135 {offsets = [0, 256], sizes = [8, 128], strides = [1, 1]} : vector<8x384xf32> to vector<8x128xf32>
    %139 = vector.extract_strided_slice %129 {offsets = [0, 384], sizes = [8, 128], strides = [1, 1]} : vector<8x512xf32> to vector<8x128xf32>
    %140 = math.tanh %139 : vector<8x128xf32>
    %141 = arith.mulf %137, %121 : vector<8x128xf32>
    %142 = arith.mulf %136, %140 : vector<8x128xf32>
    %143 = arith.addf %141, %142 : vector<8x128xf32>
    %144 = math.tanh %143 : vector<8x128xf32>
    %145 = arith.mulf %138, %144 : vector<8x128xf32>
    %c40_53 = arith.constant 40 : index
    %c0_54 = arith.constant 0 : index
    %146 = vector.load %arg13[%c40_53, %c0_54] : memref<64x128xf32, #tpu.memory_space<vmem>>, vector<8x128xf32>
    tpu.vector_store %arg13[%c40_53, %c0_54], %145 {strides = array<i32>} : memref<64x128xf32, #tpu.memory_space<vmem>>, vector<8x128xf32>,
    %c48 = arith.constant 48 : index
    %c0_55 = arith.constant 0 : index
    %147 = vector.load %arg12[%c48, %c0_55] : memref<64x512xf32, #tpu.memory_space<vmem>>, vector<8x512xf32>
    %148 = arith.truncf %145 : vector<8x128xf32> to vector<8x128xbf16>
    %c0_56 = arith.constant 0 : index
    %c0_57 = arith.constant 0 : index
    %149 = vector.load %arg14[%c0_56, %c0_57] : memref<128x512xbf16, #tpu.memory_space<vmem>>, vector<128x512xbf16>
    %cst_58 = arith.constant dense<0.000000e+00> : vector<8x512xf32>
    %150 = tpu.matmul %148, %149, %cst_58 {dimension_numbers = #tpu.dot_dimension_numbers<[1], [0], [0], [1], [0, 0, 1, 1], [], []>} : vector<8x128xbf16>, vector<128x512xbf16>, vector<8x512xf32> -> vector<8x512xf32>
    %151 = arith.addf %147, %150 : vector<8x512xf32>
    %152 = vector.extract_strided_slice %151 {offsets = [0, 0], sizes = [8, 384], strides = [1, 1]} : vector<8x512xf32> to vector<8x384xf32>
    %153 = arith.negf %152 : vector<8x384xf32>
    %154 = math.exp %153 : vector<8x384xf32>
    %cst_59 = arith.constant 1.000000e+00 : f32
    %155 = vector.broadcast %cst_59 : f32 to vector<8x384xf32>
    %156 = arith.addf %155, %154 : vector<8x384xf32>
    %157 = arith.divf %155, %156 : vector<8x384xf32>
    %158 = vector.extract_strided_slice %157 {offsets = [0, 0], sizes = [8, 128], strides = [1, 1]} : vector<8x384xf32> to vector<8x128xf32>
    %159 = vector.extract_strided_slice %157 {offsets = [0, 128], sizes = [8, 128], strides = [1, 1]} : vector<8x384xf32> to vector<8x128xf32>
    %160 = vector.extract_strided_slice %157 {offsets = [0, 256], sizes = [8, 128], strides = [1, 1]} : vector<8x384xf32> to vector<8x128xf32>
    %161 = vector.extract_strided_slice %151 {offsets = [0, 384], sizes = [8, 128], strides = [1, 1]} : vector<8x512xf32> to vector<8x128xf32>
    %162 = math.tanh %161 : vector<8x128xf32>
    %163 = arith.mulf %159, %143 : vector<8x128xf32>
    %164 = arith.mulf %158, %162 : vector<8x128xf32>
    %165 = arith.addf %163, %164 : vector<8x128xf32>
    %166 = math.tanh %165 : vector<8x128xf32>
    %167 = arith.mulf %160, %166 : vector<8x128xf32>
    %c48_60 = arith.constant 48 : index
    %c0_61 = arith.constant 0 : index
    %168 = vector.load %arg13[%c48_60, %c0_61] : memref<64x128xf32, #tpu.memory_space<vmem>>, vector<8x128xf32>
    tpu.vector_store %arg13[%c48_60, %c0_61], %167 {strides = array<i32>} : memref<64x128xf32, #tpu.memory_space<vmem>>, vector<8x128xf32>,
    %c56 = arith.constant 56 : index
    %c0_62 = arith.constant 0 : index
    %169 = vector.load %arg12[%c56, %c0_62] : memref<64x512xf32, #tpu.memory_space<vmem>>, vector<8x512xf32>
    %170 = arith.truncf %167 : vector<8x128xf32> to vector<8x128xbf16>
    %c0_63 = arith.constant 0 : index
    %c0_64 = arith.constant 0 : index
    %171 = vector.load %arg14[%c0_63, %c0_64] : memref<128x512xbf16, #tpu.memory_space<vmem>>, vector<128x512xbf16>
    %cst_65 = arith.constant dense<0.000000e+00> : vector<8x512xf32>
    %172 = tpu.matmul %170, %171, %cst_65 {dimension_numbers = #tpu.dot_dimension_numbers<[1], [0], [0], [1], [0, 0, 1, 1], [], []>} : vector<8x128xbf16>, vector<128x512xbf16>, vector<8x512xf32> -> vector<8x512xf32>
    %173 = arith.addf %169, %172 : vector<8x512xf32>
    %174 = vector.extract_strided_slice %173 {offsets = [0, 0], sizes = [8, 384], strides = [1, 1]} : vector<8x512xf32> to vector<8x384xf32>
    %175 = arith.negf %174 : vector<8x384xf32>
    %176 = math.exp %175 : vector<8x384xf32>
    %cst_66 = arith.constant 1.000000e+00 : f32
    %177 = vector.broadcast %cst_66 : f32 to vector<8x384xf32>
    %178 = arith.addf %177, %176 : vector<8x384xf32>
    %179 = arith.divf %177, %178 : vector<8x384xf32>
    %180 = vector.extract_strided_slice %179 {offsets = [0, 0], sizes = [8, 128], strides = [1, 1]} : vector<8x384xf32> to vector<8x128xf32>
    %181 = vector.extract_strided_slice %179 {offsets = [0, 128], sizes = [8, 128], strides = [1, 1]} : vector<8x384xf32> to vector<8x128xf32>
    %182 = vector.extract_strided_slice %179 {offsets = [0, 256], sizes = [8, 128], strides = [1, 1]} : vector<8x384xf32> to vector<8x128xf32>
    %183 = vector.extract_strided_slice %173 {offsets = [0, 384], sizes = [8, 128], strides = [1, 1]} : vector<8x512xf32> to vector<8x128xf32>
    %184 = math.tanh %183 : vector<8x128xf32>
    %185 = arith.mulf %181, %165 : vector<8x128xf32>
    %186 = arith.mulf %180, %184 : vector<8x128xf32>
    %187 = arith.addf %185, %186 : vector<8x128xf32>
    %188 = math.tanh %187 : vector<8x128xf32>
    %189 = arith.mulf %182, %188 : vector<8x128xf32>
    %c56_67 = arith.constant 56 : index
    %c0_68 = arith.constant 0 : index
    %190 = vector.load %arg13[%c56_67, %c0_68] : memref<64x128xf32, #tpu.memory_space<vmem>>, vector<8x128xf32>
    tpu.vector_store %arg13[%c56_67, %c0_68], %189 {strides = array<i32>} : memref<64x128xf32, #tpu.memory_space<vmem>>, vector<8x128xf32>,
    %c0_69 = arith.constant 0 : index
    %c0_70 = arith.constant 0 : index
    %191 = vector.load %arg10[%c0_69, %c0_70] : memref<8x128xf32, #tpu.memory_space<vmem>>, vector<8x128xf32>
    tpu.vector_store %arg10[%c0_69, %c0_70], %189 {strides = array<i32>} : memref<8x128xf32, #tpu.memory_space<vmem>>, vector<8x128xf32>,
    %c0_71 = arith.constant 0 : index
    %c0_72 = arith.constant 0 : index
    %192 = vector.load %arg11[%c0_71, %c0_72] : memref<8x128xf32, #tpu.memory_space<vmem>>, vector<8x128xf32>
    tpu.vector_store %arg11[%c0_71, %c0_72], %187 {strides = array<i32>} : memref<8x128xf32, #tpu.memory_space<vmem>>, vector<8x128xf32>,
    %c1_i32_73 = arith.constant 1 : i32
    %193 = tpu.memref_slice %arg16[%c1_i32_73] : memref<2x!tpu.dma_semaphore, #tpu.memory_space<semaphore_mem>> -> memref<1x!tpu.dma_semaphore, #tpu.memory_space<semaphore_mem>>
    %194 = tpu.memref_squeeze %193 : memref<1x!tpu.dma_semaphore, #tpu.memory_space<semaphore_mem>> -> memref<!tpu.dma_semaphore, #tpu.memory_space<semaphore_mem>>
    tpu.wait_dma2 semaphore(%194 : memref<!tpu.dma_semaphore, #tpu.memory_space<semaphore_mem>>) src(%arg7 : memref<128x256xbf16, #tpu.memory_space<any>>) dst(%arg15 : memref<128x256xbf16, #tpu.memory_space<vmem>>)
    %c0_74 = arith.constant 0 : index
    %c0_75 = arith.constant 0 : index
    %195 = vector.load %arg13[%c0_74, %c0_75] : memref<64x128xf32, #tpu.memory_space<vmem>>, vector<64x128xf32>
    %196 = arith.truncf %195 : vector<64x128xf32> to vector<64x128xbf16>
    %c0_76 = arith.constant 0 : index
    %c0_77 = arith.constant 0 : index
    %197 = vector.load %arg15[%c0_76, %c0_77] : memref<128x256xbf16, #tpu.memory_space<vmem>>, vector<128x256xbf16>
    %cst_78 = arith.constant dense<0.000000e+00> : vector<64x256xf32>
    %198 = tpu.matmul %196, %197, %cst_78 {dimension_numbers = #tpu.dot_dimension_numbers<[1], [0], [0], [1], [0, 0, 1, 1], [], []>} : vector<64x128xbf16>, vector<128x256xbf16>, vector<64x256xf32> -> vector<64x256xf32>
    %c0_79 = arith.constant 0 : index
    %c0_80 = arith.constant 0 : index
    %199 = vector.load %arg8[%c0_79, %c0_80] : memref<1x256xf32, #tpu.memory_space<vmem>>, vector<1x256xf32>
    %200 = vector.broadcast %199 : vector<1x256xf32> to vector<64x256xf32>
    %201 = arith.addf %198, %200 : vector<64x256xf32>
    %c0_81 = arith.constant 0 : index
    %c0_82 = arith.constant 0 : index
    %202 = vector.load %arg9[%c0_81, %c0_82] : memref<64x256xf32, #tpu.memory_space<vmem>>, vector<64x256xf32>
    tpu.vector_store %arg9[%c0_81, %c0_82], %201 {strides = array<i32>} : memref<64x256xf32, #tpu.memory_space<vmem>>, vector<64x256xf32>,
    return
  }
  func.func @transform_0(%arg0: i32) -> (i32, i32) {
    %c0_i32 = arith.constant 0 : i32
    %c0_i32_0 = arith.constant 0 : i32
    %c0_i32_1 = arith.constant 0 : i32
    return %c0_i32, %c0_i32_0 : i32, i32
  }
  func.func @transform_1(%arg0: i32) -> (i32, i32) {
    %c0_i32 = arith.constant 0 : i32
    %c0_i32_0 = arith.constant 0 : i32
    %c0_i32_1 = arith.constant 0 : i32
    return %c0_i32, %c0_i32_0 : i32, i32
  }
  func.func @transform_2(%arg0: i32) -> (i32, i32) {
    %c0_i32 = arith.constant 0 : i32
    %c0_i32_0 = arith.constant 0 : i32
    %c0_i32_1 = arith.constant 0 : i32
    return %c0_i32, %c0_i32_0 : i32, i32
  }
  func.func @transform_3(%arg0: i32) -> (i32, i32) {
    %c0_i32 = arith.constant 0 : i32
    %c0_i32_0 = arith.constant 0 : i32
    %c0_i32_1 = arith.constant 0 : i32
    return %c0_i32, %c0_i32_0 : i32, i32
  }
  func.func @transform_5(%arg0: i32) -> (i32, i32) {
    %c0_i32 = arith.constant 0 : i32
    %c0_i32_0 = arith.constant 0 : i32
    %c0_i32_1 = arith.constant 0 : i32
    return %c0_i32, %c0_i32_0 : i32, i32
  }
  func.func @transform_7(%arg0: i32) -> (i32, i32) {
    %c0_i32 = arith.constant 0 : i32
    %c0_i32_0 = arith.constant 0 : i32
    %c0_i32_1 = arith.constant 0 : i32
    return %c0_i32, %c0_i32_0 : i32, i32
  }
  func.func @transform_8(%arg0: i32) -> (i32, i32) {
    %c0_i32 = arith.constant 0 : i32
    %c0_i32_0 = arith.constant 0 : i32
    %c0_i32_1 = arith.constant 0 : i32
    return %c0_i32, %c0_i32_0 : i32, i32
  }
  func.func @transform_9(%arg0: i32) -> (i32, i32) {
    %c0_i32 = arith.constant 0 : i32
    %c0_i32_0 = arith.constant 0 : i32
    %c0_i32_1 = arith.constant 0 : i32
    return %c0_i32, %c0_i32_0 : i32, i32
  }
  func.func @transform_10(%arg0: i32) -> (i32, i32) {
    %c0_i32 = arith.constant 0 : i32
    %c0_i32_0 = arith.constant 0 : i32
    %c0_i32_1 = arith.constant 0 : i32
    return %c0_i32, %c0_i32_0 : i32, i32
  }
}

</mosaic_0001>

<bundles_post_ra>
// kernel: tpu_custom_call.1
= control target key start
LH: loop header
LB: loop body
LE: loop exit
PB: predicated region body
PF: predicated region fallthrough
CT: control target
= control target key end

     0   :  { %16 = vsyncpa [#allocation8], 0  ;;  %s3180_s0 = inlined_call_operand.hbm [shape: bf16[64,128], index: 0, kind: input, shape index: {}]   ;;  %s3181_s1 = inlined_call_operand.hbm [shape: f32[8,128], index: 1, kind: input, shape index: {}]   ;;  %s3182_s2 = inlined_call_operand.hbm [shape: f32[8,128], index: 2, kind: input, shape index: {}]   ;;  %s3183_s3 = inlined_call_operand.hbm [shape: bf16[128,512], index: 3, kind: input, shape index: {}]   ;;  %s3184_s4 = inlined_call_operand.hbm [shape: bf16[128,512], index: 4, kind: input, shape index: {}]   ;;  %s3185_s5 = inlined_call_operand.vmem [shape: f32[1,512], index: 5, kind: input, shape index: {}]   ;;  %s3186_s6 = inlined_call_operand.hbm [shape: bf16[128,256], index: 6, kind: input, shape index: {}]   ;;  %s3187_s7 = inlined_call_operand.vmem [shape: f32[1,256], index: 7, kind: input, shape index: {}]   ;;  %s3188_s8 = inlined_call_operand.hbm [shape: f32[64,256], index: 8, kind: output, shape index: {0}]   ;;  %s3189_s9 = inlined_call_operand.hbm [shape: f32[8,128], index: 9, kind: output, shape index: {1}]   ;;  %s3190_s10 = inlined_call_operand.hbm [shape: f32[8,128], index: 10, kind: output, shape index: {2}]  }
   0x1   :  { %17 = vsyncpa [#allocation11], 0 }
   0x2   :  { %18 = vsyncpa [#allocation14], 0 }
   0x3   :  { %19 = vsyncpa [#allocation9], 0 }
   0x4   :  { %20 = vsyncpa [#allocation17], 0  ;;  %s2394_s13 = smov [#allocation10]   ;;  %s2395_s15 = smov [#allocation7]  }
   0x5   :  { %s39_s14 = sshll.u32 %s2394_s13, 4  ;;  %s26_s16 = sshll.u32 %s2395_s15, 4  ;;  %s40_s14 = int_to_ptr.vmem [resolvable:$true] %s39_s14  ;;  %s2470_s16 = int_to_ptr.vmem [resolvable:$true] %s26_s16 }
   0x6   :  { %s2226_s19 = scalar_lea.hbm %s3181_s1, 128 }
   0x7   :  { %p2227_p0 = scmp.ne.s32.totalorder %s3181_s1, %s2226_s19  ;;  %p2230_p1 = scmp.lt.u32.totalorder %s2226_s19, %s3181_s1 }
   0x9   :  { %p2232_p2 = pnand %p2230_p1, %p2227_p0 }
   0xb   :  { %2235 = shalt.err (!%p2232_p2)
}
   0xc   :  { %s2236_s24 = scalar_lea.vmem %s40_s14, 128  ;;  %p2241_p4 = scmp.lt.s32.totalorder %s40_s14, %s40_s14 }
   0xd   :  { %p2237_p3 = scmp.ne.s32.totalorder %s40_s14, %s2236_s24  ;;  %p2242_p5 = scmp.lt.s32.totalorder %s2236_s24, %s2236_s24 }
   0xf   :  { %p2243_p6 = por %p2242_p5, %p2241_p4 }
  0x11   :  { %p2244_p7 = pnand %p2243_p6, %p2237_p3 }
  0x13   :  { %2247 = shalt.err (!%p2244_p7)
}
  0x14   :  { %42 = dma.hbm_to_vmem [thread:$0]  %s3181_s1, 128, %s40_s14, [#allocation11]  }
  0x15   :  { %s2248_s29 = scalar_lea.hbm %s3180_s0, 512 }
  0x16   :  { %p2249_p8 = scmp.ne.s32.totalorder %s3180_s0, %s2248_s29  ;;  %p2252_p9 = scmp.lt.u32.totalorder %s2248_s29, %s3180_s0 }
  0x18   :  { %p2254_p10 = pnand %p2252_p9, %p2249_p8 }
  0x1a   :  { %2257 = shalt.err (!%p2254_p10)
}
  0x1b   :  { %s2258_s15 = scalar_lea.vmem %s2470_s16, 512  ;;  %p2263_p12 = scmp.lt.s32.totalorder %s2470_s16, %s2470_s16 }
  0x1c   :  { %p2259_p11 = scmp.ne.s32.totalorder %s2470_s16, %s2258_s15  ;;  %p2264_p13 = scmp.lt.s32.totalorder %s2258_s15, %s2258_s15 }
  0x1e   :  { %p2265_p0 = por %p2264_p13, %p2263_p12 }
  0x20   :  { %p2266_p1 = pnand %p2265_p0, %p2259_p11 }
  0x22   :  { %2269 = shalt.err (!%p2266_p1)
}
  0x23   :  { %s2396_s1 = smov 64   ;;  %s2397_s14 = smov 4  }
  0x24   :  { %32 = dma.hbm_to_vmem [thread:$0]  %s3180_s0, 512, %s2470_s16, [#allocation8], %s2396_s1, %s2396_s1, %s2397_s14  }
  0x25   :  { %s2398_s19 = smov [#allocation12]   ;;  %s2399_s21 = smov [#allocation13]  }
  0x26   :  { %s49_s20 = sshll.u32 %s2398_s19, 4  ;;  %s58_s22 = sshll.u32 %s2399_s21, 4  ;;  %s50_s20 = int_to_ptr.vmem [resolvable:$true] %s49_s20  ;;  %s2504_s22 = int_to_ptr.vmem [resolvable:$true] %s58_s22 }
  0x27   :  { %s2270_s25 = scalar_lea.hbm %s3182_s2, 128 }
  0x28   :  { %p2271_p2 = scmp.ne.s32.totalorder %s3182_s2, %s2270_s25  ;;  %p2274_p3 = scmp.lt.u32.totalorder %s2270_s25, %s3182_s2 }
  0x2a   :  { %p2276_p4 = pnand %p2274_p3, %p2271_p2 }
  0x2c   :  { %2279 = shalt.err (!%p2276_p4)
}
  0x2d   :  { %s2280_s0 = scalar_lea.vmem %s50_s20, 128  ;;  %p2285_p6 = scmp.lt.s32.totalorder %s50_s20, %s50_s20 }
  0x2e   :  { %p2281_p5 = scmp.ne.s32.totalorder %s50_s20, %s2280_s0  ;;  %p2286_p7 = scmp.lt.s32.totalorder %s2280_s0, %s2280_s0 }
  0x30   :  { %p2287_p8 = por %p2286_p7, %p2285_p6 }
  0x32   :  { %p2288_p9 = pnand %p2287_p8, %p2281_p5 }
  0x34   :  { %2291 = shalt.err (!%p2288_p9)
}
  0x35   :  { %52 = dma.hbm_to_vmem [thread:$0]  %s3182_s2, 128, %s50_s20, [#allocation11]  }
  0x36   :  { %s2292_s13 = scalar_lea.hbm %s3183_s3, 4096 }
  0x37   :  { %p2293_p10 = scmp.ne.s32.totalorder %s3183_s3, %s2292_s13  ;;  %p2296_p11 = scmp.lt.u32.totalorder %s2292_s13, %s3183_s3 }
  0x39   :  { %p2298_p12 = pnand %p2296_p11, %p2293_p10 }
  0x3b   :  { %2301 = shalt.err (!%p2298_p12)
}
  0x3c   :  { %s2302_s21 = scalar_lea.vmem %s2504_s22, 4096  ;;  %p2307_p0 = scmp.lt.s32.totalorder %s2504_s22, %s2504_s22 }
  0x3d   :  { %p2303_p13 = scmp.ne.s32.totalorder %s2504_s22, %s2302_s21  ;;  %p2308_p1 = scmp.lt.s32.totalorder %s2302_s21, %s2302_s21 }
  0x3f   :  { %p2309_p2 = por %p2308_p1, %p2307_p0 }
  0x41   :  { %p2310_p3 = pnand %p2309_p2, %p2303_p13 }
  0x43   :  { %2313 = shalt.err (!%p2310_p3)
}
  0x44   :  { %s2400_s2 = smov 256   ;;  %s2401_s20 = smov 16  }
  0x45   :  { %64 = dma.hbm_to_vmem [thread:$0]  %s3183_s3, 4096, %s2504_s22, [#allocation14], %s2400_s2, %s2400_s2, %s2401_s20  }
  0x46   :  { %2380 = dma.done.wait [#allocation8], 512  }
  0x47   :  { %2381 = vsyncadd [#allocation8], 4294966784 }
  0x48   :  { %2382 = dma.done.wait [#allocation11], 256  }
  0x49   :  { %2383 = vsyncadd [#allocation11], 4294967040 }
  0x4a   :  { %2384 = dma.done.wait [#allocation14], 4096  }
  0x4b   :  { %2385 = vsyncadd [#allocation14], 4294963200  ;;  %s86_s25 = sld [smem:[#allocation0]]   ;;  %s2402_s26 = smov 512   ;;  %v3193_v0 = vmov 0   ;;  %v194_v37 = vlaneseq }
  0x4c   :  { %98 = sst [smem:[#allocation20]] %s2402_s26  ;;  %430 = vmatprep.mubr.bf16.mxu1 %v3193_v0  ;;  %s2404_s27 = smov [#allocation4]  }
  0x4d   :  { %100 = sst [smem:[#allocation20 + $0x1]] %s2402_s26  ;;  %s94_s28 = sshll.u32 %s2404_s27, 4  ;;  %v2562_v38 = vshrl.u32 %v194_v37, 7  ;;  %s95_s28 = int_to_ptr.vmem [resolvable:$true] %s94_s28 }
  0x4e   :  { %102 = sst [smem:[#allocation20 + $0x2]] %s2397_s14  ;;  %s2405_s29 = smov 128  }
  0x4f   :  { %104 = sst [smem:[#allocation20 + $0x3]] %s2396_s1  ;;  %s2406_s0 = smov 2   ;;  %v3192_v39 = vsub.s32 0, %v2562_v38  ;;  %v3191_v41 = vsub.s32 1, %v2562_v38 }
  0x50   :  { %110 = sst [smem:[#allocation20 + $0x6]] %s2400_s2  ;;  %s2407_s16 = smov [#allocation6]  }
  0x51   :  { %112 = sst [smem:[#allocation20 + $0x7]] %s2396_s1  ;;  %s1959_s3 = sshll.u32 %s86_s25, 26 }
  0x52   :  { %114 = sst [smem:[#allocation20 + $0x8]] %s2397_s14  ;;  %s1960_s22 = sadd.s32 134217728, %s1959_s3 }
  0x53   :  { %106 = sst [smem:[#allocation20 + $0x4]] %s2405_s29  ;;  %s2408_s30 = smov [#allocation19]  }
  0x54   :  { %108 = sst [smem:[#allocation20 + $0x5]] %s2406_s0  ;;  %s2409_s13 = smov [#allocation5]  }
  0x55   :  { %116 = dma.general %s3184_s4, 4096, %s95_s28, %s2407_s16, %s2408_s30, [#allocation20], %s1960_s22, 0  }
  0x56   :  { %133 = sst [smem:[#allocation22]] %s2400_s2  ;;  %s129_s15 = sshll.u32 %s2409_s13, 4  ;;  %s130_s15 = int_to_ptr.vmem [resolvable:$true] %s129_s15 }
  0x57   :  { %135 = sst [smem:[#allocation22 + $0x1]] %s2400_s2  ;;  %s2410_s17 = smov [#allocation6 + $0x1]  }
  0x58   :  { %137 = sst [smem:[#allocation22 + $0x2]] %s2406_s0  ;;  %s2411_s18 = smov [#allocation21]  }
  0x59   :  { %139 = sst [smem:[#allocation22 + $0x3]] %s2396_s1 }
  0x5a   :  { %141 = sst [smem:[#allocation22 + $0x4]] %s2405_s29 }
  0x5b   :  { %143 = sst [smem:[#allocation22 + $0x5]] %s2406_s0 }
  0x5c   :  { %145 = sst [smem:[#allocation22 + $0x6]] %s2405_s29 }
  0x5d   :  { %147 = sst [smem:[#allocation22 + $0x7]] %s2396_s1 }
  0x5e   :  { %149 = sst [smem:[#allocation22 + $0x8]] %s2397_s14 }
  0x5f   :  { %151 = dma.general %s3186_s6, 2048, %s130_s15, %s2410_s17, %s2411_s18, [#allocation22], %s1960_s22, 0  }
  0x60   :  { %v2046_v1 = vld [vmem:[#allocation13 + $0x4] ss:$16 sps:$4 sm:$0xff]   ;;  %v2048_v2 = vld [vmem:[#allocation13] ss:$16 sps:$4 sm:$0xff]   ;;  %v2073_v17 = vld [vmem:[#allocation13 + $0xc] ss:$16 sps:$4 sm:$0xff]  }
  0x61   :  { %398 = vmatprep.subr.bf16.mxu1 %v2046_v1  ;;  %v2049_v3 = vld [vmem:[#allocation13 + $0x24] ss:$16 sps:$4 sm:$0xff]   ;;  %v2051_v4 = vld [vmem:[#allocation13 + $0x20] ss:$16 sps:$4 sm:$0xff]   ;;  %v2071_v19 = vld [vmem:[#allocation13 + $0x8] ss:$16 sps:$4 sm:$0xff]  }
  0x62   :  { %399 = vmatpush1.bf16.msra.mxu1 %v2048_v2  ;;  %v2052_v5 = vld [vmem:[#allocation13 + $0x44] ss:$16 sps:$4 sm:$0xff]   ;;  %v2054_v6 = vld [vmem:[#allocation13 + $0x40] ss:$16 sps:$4 sm:$0xff]   ;;  %v2076_v20 = vld [vmem:[#allocation13 + $0x2c] ss:$16 sps:$4 sm:$0xff]  }
  0x63   :  { %400 = vmatprep.subr.bf16.mxu1 %v2049_v3  ;;  %v2055_v7 = vld [vmem:[#allocation13 + $0x64] ss:$16 sps:$4 sm:$0xff]   ;;  %v2057_v8 = vld [vmem:[#allocation13 + $0x60] ss:$16 sps:$4 sm:$0xff]   ;;  %v2074_v21 = vld [vmem:[#allocation13 + $0x28] ss:$16 sps:$4 sm:$0xff]  }
  0x64   :  { %v2058_v9 = vld [vmem:[#allocation13 + $0x84] ss:$16 sps:$4 sm:$0xff]   ;;  %v2060_v10 = vld [vmem:[#allocation13 + $0x80] ss:$16 sps:$4 sm:$0xff]   ;;  %v2080_v22 = vld [vmem:[#allocation13 + $0x4c] ss:$16 sps:$4 sm:$0xff]  }
  0x65   :  { %v2061_v11 = vld [vmem:[#allocation13 + $0xa4] ss:$16 sps:$4 sm:$0xff]   ;;  %v2063_v12 = vld [vmem:[#allocation13 + $0xa0] ss:$16 sps:$4 sm:$0xff]   ;;  %v2077_v23 = vld [vmem:[#allocation7 + $0x8] sm:$0xff]   ;;  %3197 = vst [vmem:[#allocation30_spill] sm:$0xff] %v2562_v38 }
  0x66   :  { %401 = vmatpush1.bf16.msra.mxu1 %v2051_v4  ;;  %v2064_v13 = vld [vmem:[#allocation13 + $0xc4] ss:$16 sps:$4 sm:$0xff]   ;;  %v2066_v14 = vld [vmem:[#allocation13 + $0xc0] ss:$16 sps:$4 sm:$0xff]   ;;  %v2078_v24 = vld [vmem:[#allocation13 + $0x48] ss:$16 sps:$4 sm:$0xff]  }
  0x67   :  { %402 = vmatprep.subr.bf16.mxu1 %v2052_v5  ;;  %v2067_v15 = vld [vmem:[#allocation13 + $0xe4] ss:$16 sps:$4 sm:$0xff]   ;;  %v2069_v16 = vld [vmem:[#allocation13 + $0xe0] ss:$16 sps:$4 sm:$0xff]   ;;  %v2083_v25 = vld [vmem:[#allocation13 + $0x6c] ss:$16 sps:$4 sm:$0xff]  }
  0x68   :  { %v2070_v18 = vld [vmem:[#allocation7] sm:$0xff]   ;;  %v2081_v26 = vld [vmem:[#allocation13 + $0x68] ss:$16 sps:$4 sm:$0xff]   ;;  %v2087_v27 = vld [vmem:[#allocation13 + $0x8c] ss:$16 sps:$4 sm:$0xff]  }
  0x69   :  { %v2084_v28 = vld [vmem:[#allocation7 + $0x10] sm:$0xff]   ;;  %v2085_v29 = vld [vmem:[#allocation13 + $0x88] ss:$16 sps:$4 sm:$0xff]   ;;  %v2090_v30 = vld [vmem:[#allocation13 + $0xac] ss:$16 sps:$4 sm:$0xff]  }
  0x6a   :  { %403 = vmatpush1.bf16.msra.mxu1 %v2054_v6  ;;  %v2088_v31 = vld [vmem:[#allocation13 + $0xa8] ss:$16 sps:$4 sm:$0xff]   ;;  %v2094_v32 = vld [vmem:[#allocation13 + $0xcc] ss:$16 sps:$4 sm:$0xff]   ;;  %v192_v40 = vld [vmem:[%s3185_s5] sm:$0xf] }
  0x6b   :  { %404 = vmatprep.subr.bf16.mxu1 %v2055_v7  ;;  %v2091_v33 = vld [vmem:[#allocation7 + $0x18] sm:$0xff]   ;;  %v197_v42 = vrot.slane %v192_v40, %v3192_v39  ;;  %v201_v43 = vrot.slane %v192_v40, %v3191_v41 }
  0x6c   :  { %v2092_v34 = vld [vmem:[#allocation13 + $0xc8] ss:$16 sps:$4 sm:$0xff]   ;;  %v2097_v35 = vld [vmem:[#allocation13 + $0xec] ss:$16 sps:$4 sm:$0xff]  }
  0x6d   :  { %v2095_v36 = vld [vmem:[#allocation13 + $0xe8] ss:$16 sps:$4 sm:$0xff]  }
  0x6e   :  { %405 = vmatpush1.bf16.msra.mxu1 %v2057_v8  ;;  %v204_v8 = vsub.s32 2, %v2562_v38 }
  0x6f   :  { %406 = vmatprep.subr.bf16.mxu1 %v2058_v9 }
  0x72   :  { %407 = vmatpush1.bf16.msra.mxu1 %v2060_v10 }
  0x73   :  { %408 = vmatprep.subr.bf16.mxu1 %v2061_v11  ;;  %v208_v11 = vsub.s32 3, %v2562_v38 }
  0x76   :  { %409 = vmatpush1.bf16.msra.mxu1 %v2063_v12 }
  0x77   :  { %410 = vmatprep.subr.bf16.mxu1 %v2064_v13 }
  0x7a   :  { %411 = vmatpush1.bf16.msra.mxu1 %v2066_v14 }
  0x7b   :  { %412 = vmatprep.subr.bf16.mxu1 %v2067_v15  ;;  %v205_v15 = vrot.slane %v192_v40, %v204_v8 }
  0x7e   :  { %413 = vmatpush1.bf16.msra.mxu1 %v2069_v16  ;;  %v209_v16 = vrot.slane %v192_v40, %v208_v11 }
  0x7f   :  { %471 = vmatprep.subr.bf16.mxu1 %v2073_v17 }
  0x81   :  { %431 = vmatmul.mubr.bf16.vlgmr.msra.gmra.mrb[0].mxu1 %v2070_v18 }
  0x82   :  { %472 = vmatpush1.bf16.msra.mxu1 %v2071_v19  ;;  %440 = vmatprep.mubr.bf16.mxu1 %v3193_v0 }
  0x83   :  { %473 = vmatprep.subr.bf16.mxu1 %v2076_v20 }
  0x86   :  { %474 = vmatpush1.bf16.msra.mxu1 %v2074_v21 }
  0x87   :  { %475 = vmatprep.subr.bf16.mxu1 %v2080_v22 }
  0x89   :  { %441 = vmatmul.mubr.bf16.gmra.mrb[4].mxu1 %v2077_v23 }
  0x8a   :  { %476 = vmatpush1.bf16.msra.mxu1 %v2078_v24  ;;  %450 = vmatprep.mubr.bf16.mxu1 %v3193_v0 }
  0x8b   :  { %477 = vmatprep.subr.bf16.mxu1 %v2083_v25 }
  0x8e   :  { %478 = vmatpush1.bf16.msra.mxu1 %v2081_v26 }
  0x8f   :  { %479 = vmatprep.subr.bf16.mxu1 %v2087_v27 }
  0x91   :  { %451 = vmatmul.mubr.bf16.gmra.mrb[8].mxu1 %v2084_v28 }
  0x92   :  { %480 = vmatpush1.bf16.msra.mxu1 %v2085_v29  ;;  %460 = vmatprep.mubr.bf16.mxu1 %v3193_v0 }
  0x93   :  { %481 = vmatprep.subr.bf16.mxu1 %v2090_v30 }
  0x96   :  { %482 = vmatpush1.bf16.msra.mxu1 %v2088_v31 }
  0x97   :  { %483 = vmatprep.subr.bf16.mxu1 %v2094_v32 }
  0x99   :  { %461 = vmatmul.mubr.bf16.gmra.mrb[12].mxu1 %v2091_v33 }
  0x9a   :  { %484 = vmatpush1.bf16.msra.mxu1 %v2092_v34  ;;  %503 = vmatprep.mubr.bf16.mxu1 %v3193_v0 }
  0x9b   :  { %485 = vmatprep.subr.bf16.mxu1 %v2097_v35 }
  0x9e   :  { %486 = vmatpush1.bf16.msra.mxu1 %v2095_v36 }
  0xa1   :  { %504 = vmatmul.mubr.bf16.vlgmr.msra.gmra.mrb[16].mxu1 %v2070_v18 }
  0xa2   :  { %513 = vmatprep.mubr.bf16.mxu1 %v3193_v0 }
  0xa9   :  { %514 = vmatmul.mubr.bf16.gmra.mrb[20].mxu1 %v2077_v23 }
  0xaa   :  { %523 = vmatprep.mubr.bf16.mxu1 %v3193_v0 }
  0xb1   :  { %524 = vmatmul.mubr.bf16.gmra.mrb[24].mxu1 %v2084_v28 }
  0xb2   :  { %533 = vmatprep.mubr.bf16.mxu1 %v3193_v0 }
  0xb9   :  { %534 = vmatmul.mubr.bf16.gmra.mrb[28].mxu1 %v2091_v33 }
 0x154   :  { %v432_v44 = vpop.f32.mrb[0].mxu1 }
 0x155   :  { %v2573_v45 = vadd.f32 %v432_v44, %v197_v42  ;;  %v434_v46 = vpop.f32.mrb[1].mxu1 }
 0x156   :  { %v2575_v47 = vadd.f32 %v434_v46, %v201_v43  ;;  %v436_v48 = vpop.f32.mrb[2].mxu1 }
 0x157   :  { %v2577_v49 = vadd.f32 %v436_v48, %v197_v42  ;;  %v438_v50 = vpop.f32.mrb[3].mxu1 }
 0x158   :  { %v2579_v51 = vadd.f32 %v438_v50, %v201_v43 }
 0x15c   :  { %v442_v52 = vpop.f32.mrb[4].mxu1 }
 0x15d   :  { %v2581_v53 = vadd.f32 %v442_v52, %v197_v42  ;;  %v444_v54 = vpop.f32.mrb[5].mxu1 }
 0x15e   :  { %v2583_v55 = vadd.f32 %v444_v54, %v201_v43  ;;  %v446_v56 = vpop.f32.mrb[6].mxu1 }
 0x15f   :  { %v2585_v57 = vadd.f32 %v446_v56, %v197_v42  ;;  %v448_v58 = vpop.f32.mrb[7].mxu1 }
 0x160   :  { %v2587_v59 = vadd.f32 %v448_v58, %v201_v43 }
 0x164   :  { %v452_v60 = vpop.f32.mrb[8].mxu1 }
 0x165   :  { %v2589_v61 = vadd.f32 %v452_v60, %v197_v42  ;;  %v454_v62 = vpop.f32.mrb[9].mxu1 }
 0x166   :  { %v2591_v63 = vadd.f32 %v454_v62, %v201_v43  ;;  %v456_v1 = vpop.f32.mrb[10].mxu1 }
 0x167   :  { %3198 = vst [vmem:[#allocation31_spill] sm:$0xff] %v2589_v61  ;;  %v2593_v2 = vadd.f32 %v456_v1, %v197_v42  ;;  %v458_v3 = vpop.f32.mrb[11].mxu1 }
 0x168   :  { %3199 = vst [vmem:[#allocation32_spill] sm:$0xff] %v2591_v63  ;;  %v2595_v4 = vadd.f32 %v458_v3, %v201_v43 }
 0x169   :  { %3200 = vst [vmem:[#allocation33_spill] sm:$0xff] %v2593_v2 }
 0x16a   :  { %3201 = vst [vmem:[#allocation34_spill] sm:$0xff] %v2595_v4 }
 0x16c   :  { %v462_v5 = vpop.f32.mrb[12].mxu1 }
 0x16d   :  { %v2597_v6 = vadd.f32 %v462_v5, %v197_v42  ;;  %v464_v7 = vpop.f32.mrb[13].mxu1 }
 0x16e   :  { %v2600_v9 = vadd.f32 %v464_v7, %v201_v43  ;;  %v466_v10 = vpop.f32.mrb[14].mxu1 }
 0x16f   :  { %3202 = vst [vmem:[#allocation35_spill] sm:$0xff] %v2597_v6  ;;  %v2603_v12 = vadd.f32 %v466_v10, %v197_v42  ;;  %v468_v13 = vpop.f32.mrb[15].mxu1 }
 0x170   :  { %3203 = vst [vmem:[#allocation36_spill] sm:$0xff] %v2600_v9  ;;  %v2605_v14 = vadd.f32 %v468_v13, %v201_v43 }
 0x171   :  { %3204 = vst [vmem:[#allocation37_spill] sm:$0xff] %v2603_v12 }
 0x172   :  { %3205 = vst [vmem:[#allocation38_spill] sm:$0xff] %v2605_v14 }
 0x174   :  { %v505_v17 = vpop.f32.mrb[16].mxu1 }
 0x175   :  { %v2607_v18 = vadd.f32 %v505_v17, %v205_v15  ;;  %v507_v19 = vpop.f32.mrb[17].mxu1 }
 0x176   :  { %v2609_v20 = vadd.f32 %v507_v19, %v209_v16  ;;  %v509_v21 = vpop.f32.mrb[18].mxu1 }
 0x177   :  { %v2611_v22 = vadd.f32 %v509_v21, %v205_v15  ;;  %v511_v23 = vpop.f32.mrb[19].mxu1 }
 0x178   :  { %v2613_v24 = vadd.f32 %v511_v23, %v209_v16 }
 0x17c   :  { %v515_v25 = vpop.f32.mrb[20].mxu1 }
 0x17d   :  { %v2615_v26 = vadd.f32 %v515_v25, %v205_v15  ;;  %v517_v27 = vpop.f32.mrb[21].mxu1 }
 0x17e   :  { %v2617_v28 = vadd.f32 %v517_v27, %v209_v16  ;;  %v519_v29 = vpop.f32.mrb[22].mxu1 }
 0x17f   :  { %v2619_v30 = vadd.f32 %v519_v29, %v205_v15  ;;  %v521_v31 = vpop.f32.mrb[23].mxu1 }
 0x180   :  { %v2621_v32 = vadd.f32 %v521_v31, %v209_v16 }
 0x182   :  { %3206 = vst [vmem:[#allocation39_spill] sm:$0xff] %v2621_v32 }
 0x184   :  { %v525_v33 = vpop.f32.mrb[24].mxu1 }
 0x185   :  { %v2623_v34 = vadd.f32 %v525_v33, %v205_v15  ;;  %v527_v35 = vpop.f32.mrb[25].mxu1 }
 0x186   :  { %v2625_v36 = vadd.f32 %v527_v35, %v209_v16  ;;  %v529_v37 = vpop.f32.mrb[26].mxu1 }
 0x187   :  { %3207 = vst [vmem:[#allocation40_spill] sm:$0xff] %v2623_v34  ;;  %v2627_v40 = vadd.f32 %v529_v37, %v205_v15  ;;  %v531_v42 = vpop.f32.mrb[27].mxu1 }
 0x188   :  { %3208 = vst [vmem:[#allocation41_spill] sm:$0xff] %v2625_v36  ;;  %v2629_v43 = vadd.f32 %v531_v42, %v209_v16 }
 0x189   :  { %3209 = vst [vmem:[#allocation42_spill] sm:$0xff] %v2627_v40 }
 0x18a   :  { %3210 = vst [vmem:[#allocation43_spill] sm:$0xff] %v2629_v43 }
 0x18c   :  { %v535_v44 = vpop.f32.mrb[28].mxu1 }
 0x18d   :  { %v2631_v46 = vadd.f32 %v535_v44, %v205_v15  ;;  %v537_v48 = vpop.f32.mrb[29].mxu1 }
 0x18e   :  { %v2633_v50 = vadd.f32 %v537_v48, %v209_v16  ;;  %v539_v52 = vpop.f32.mrb[30].mxu1 }
 0x18f   :  { %3211 = vst [vmem:[#allocation44_spill] sm:$0xff] %v2631_v46  ;;  %v2635_v54 = vadd.f32 %v539_v52, %v205_v15  ;;  %v541_v56 = vpop.f32.mrb[31].mxu1 }
 0x190   :  { %3212 = vst [vmem:[#allocation45_spill] sm:$0xff] %v2633_v50  ;;  %v2637_v58 = vadd.f32 %v541_v56, %v209_v16 }
 0x191   :  { %3213 = vst [vmem:[#allocation46_spill] sm:$0xff] %v2635_v54 }
 0x192   :  { %3214 = vst [vmem:[#allocation47_spill] sm:$0xff] %v2637_v58 }
 0x193   :  { %2386 = dma.done.wait [#allocation6], 4096 }
 0x194   :  { %2387 = vsyncadd [#allocation6], 4294963200  ;;  %651 = vmatprep.mubr.bf16.mxu0 %v3193_v0  ;;  %692 = vmatprep.mubr.bf16.mxu1 %v3193_v0  ;;  %v2641_v60 = vld [vmem:[#allocation4 + $0x8] sm:$0xff]  ;;  %v2643_v62 = vld [vmem:[#allocation4] sm:$0xff]  ;;  %v3215_v14 = vmov 0  }
 0x195   :  { %v2645_v1 = vld [vmem:[#allocation4 + $0x28] sm:$0xff]  ;;  %619 = vmatprep.subr.bf16.mxu0 %v2641_v60  ;;  %v2649_v3 = vld [vmem:[#allocation4 + $0x18] sm:$0xff]  ;;  %v2652_v5 = vld [vmem:[#allocation4 + $0x20] sm:$0xff] }
 0x196   :  { %620 = vmatpush1.bf16.msra.mxu0 %v2643_v62  ;;  %660 = vmatprep.subr.bf16.mxu1 %v2649_v3  ;;  %v2655_v7 = vld [vmem:[#allocation4 + $0x10] sm:$0xff]  ;;  %v2657_v8 = vld [vmem:[#allocation4 + $0x38] sm:$0xff]  ;;  %v2659_v10 = vld [vmem:[#allocation4 + $0x48] sm:$0xff] }
 0x197   :  { %621 = vmatprep.subr.bf16.mxu0 %v2645_v1  ;;  %661 = vmatpush1.bf16.msra.mxu1 %v2655_v7  ;;  %v2663_v11 = vld [vmem:[#allocation4 + $0x30] sm:$0xff]  ;;  %v2666_v13 = vld [vmem:[#allocation4 + $0x58] sm:$0xff]  ;;  %v2669_v15 = vld [vmem:[#allocation4 + $0x40] sm:$0xff] }
 0x198   :  { %662 = vmatprep.subr.bf16.mxu1 %v2657_v8  ;;  %v2671_v16 = vld [vmem:[#allocation4 + $0x68] sm:$0xff]  ;;  %v2675_v17 = vld [vmem:[#allocation4 + $0x50] sm:$0xff]  ;;  %v2678_v19 = vld [vmem:[#allocation4 + $0x78] sm:$0xff] }
 0x199   :  { %v2681_v21 = vld [vmem:[#allocation4 + $0x60] sm:$0xff]  ;;  %v2683_v23 = vld [vmem:[#allocation4 + $0x88] sm:$0xff]  ;;  %v2687_v25 = vld [vmem:[#allocation4 + $0x70] sm:$0xff] }
 0x19a   :  { %622 = vmatpush1.bf16.msra.mxu0 %v2652_v5  ;;  %v2690_v27 = vld [vmem:[#allocation4 + $0x98] sm:$0xff]  ;;  %v2693_v29 = vld [vmem:[#allocation4 + $0x80] sm:$0xff]  ;;  %v2695_v31 = vld [vmem:[#allocation4 + $0xa8] sm:$0xff] }
 0x19b   :  { %623 = vmatprep.subr.bf16.mxu0 %v2659_v10  ;;  %663 = vmatpush1.bf16.msra.mxu1 %v2663_v11  ;;  %v2699_v33 = vld [vmem:[#allocation4 + $0x90] sm:$0xff]  ;;  %v2702_v35 = vld [vmem:[#allocation4 + $0xb8] sm:$0xff]  ;;  %v2705_v37 = vld [vmem:[#allocation4 + $0xa0] sm:$0xff] }
 0x19c   :  { %664 = vmatprep.subr.bf16.mxu1 %v2666_v13  ;;  %v2707_v42 = vld [vmem:[#allocation4 + $0xc8] sm:$0xff]  ;;  %v2711_v44 = vld [vmem:[#allocation4 + $0xb0] sm:$0xff]  ;;  %v2714_v48 = vld [vmem:[#allocation4 + $0xd8] sm:$0xff] }
 0x19d   :  { %v2717_v52 = vld [vmem:[#allocation4 + $0xc0] sm:$0xff]  ;;  %v2719_v56 = vld [vmem:[#allocation4 + $0xe8] sm:$0xff]  ;;  %v2723_v41 = vld [vmem:[#allocation4 + $0xd0] sm:$0xff] }
 0x19e   :  { %624 = vmatpush1.bf16.msra.mxu0 %v2669_v15  ;;  %v580_v39 = vld [vmem:[#allocation10] sm:$0xff]  ;;  %v2726_v0 = vld [vmem:[#allocation4 + $0xf8] sm:$0xff]  ;;  %v2733_v54 = vld [vmem:[#allocation4 + $0xf0] sm:$0xff] }
 0x19f   :  { %625 = vmatprep.subr.bf16.mxu0 %v2671_v16  ;;  %665 = vmatpush1.bf16.msra.mxu1 %v2675_v17  ;;  %v2729_v38 = vld [vmem:[#allocation4 + $0xe0] sm:$0xff]  ;;  %v586_v58 = vpack.c.bf16 %v580_v39, %v580_v39 }
 0x1a0   :  { %666 = vmatprep.subr.bf16.mxu1 %v2678_v19 }
 0x1a2   :  { %626 = vmatpush1.bf16.msra.mxu0 %v2681_v21 }
 0x1a3   :  { %627 = vmatprep.subr.bf16.mxu0 %v2683_v23  ;;  %667 = vmatpush1.bf16.msra.mxu1 %v2687_v25 }
 0x1a4   :  { %668 = vmatprep.subr.bf16.mxu1 %v2690_v27 }
 0x1a6   :  { %628 = vmatpush1.bf16.msra.mxu0 %v2693_v29 }
 0x1a7   :  { %629 = vmatprep.subr.bf16.mxu0 %v2695_v31  ;;  %669 = vmatpush1.bf16.msra.mxu1 %v2699_v33 }
 0x1a8   :  { %670 = vmatprep.subr.bf16.mxu1 %v2702_v35 }
 0x1aa   :  { %630 = vmatpush1.bf16.msra.mxu0 %v2705_v37 }
 0x1ab   :  { %631 = vmatprep.subr.bf16.mxu0 %v2707_v42  ;;  %671 = vmatpush1.bf16.msra.mxu1 %v2711_v44 }
 0x1ac   :  { %672 = vmatprep.subr.bf16.mxu1 %v2714_v48 }
 0x1ae   :  { %632 = vmatpush1.bf16.msra.mxu0 %v2717_v52 }
 0x1af   :  { %633 = vmatprep.subr.bf16.mxu0 %v2719_v56  ;;  %673 = vmatpush1.bf16.msra.mxu1 %v2723_v41 }
 0x1b0   :  { %674 = vmatprep.subr.bf16.mxu1 %v2726_v0 }
 0x1b2   :  { %634 = vmatpush1.bf16.msra.mxu0 %v2729_v38 }
 0x1b3   :  { %767 = vmatprep.subr.bf16.mxu0 %v2641_v60  ;;  %675 = vmatpush1.bf16.msra.mxu1 %v2733_v54 }
 0x1b4   :  { %808 = vmatprep.subr.bf16.mxu1 %v2649_v3 }
 0x1b5   :  { %652 = vmatmul.mubr.bf16.vlgmr.msra.gmra.mrb[0].mxu0 %v586_v58 }
 0x1b6   :  { %768 = vmatpush1.bf16.msra.mxu0 %v2643_v62  ;;  %799 = vmatprep.mubr.bf16.mxu0 %v3215_v14 }
 0x1b7   :  { %693 = vmatmul.mubr.bf16.vlgmr.msra.gmra.mrb[32].mxu1 %v586_v58  ;;  %769 = vmatprep.subr.bf16.mxu0 %v2645_v1 }
 0x1b8   :  { %809 = vmatpush1.bf16.msra.mxu1 %v2655_v7  ;;  %840 = vmatprep.mubr.bf16.mxu1 %v3215_v14 }
 0x1b9   :  { %810 = vmatprep.subr.bf16.mxu1 %v2657_v8 }
 0x1ba   :  { %770 = vmatpush1.bf16.msra.mxu0 %v2652_v5 }
 0x1bb   :  { %771 = vmatprep.subr.bf16.mxu0 %v2659_v10 }
 0x1bc   :  { %811 = vmatpush1.bf16.msra.mxu1 %v2663_v11 }
 0x1bd   :  { %812 = vmatprep.subr.bf16.mxu1 %v2666_v13 }
 0x1be   :  { %772 = vmatpush1.bf16.msra.mxu0 %v2669_v15 }
 0x1bf   :  { %773 = vmatprep.subr.bf16.mxu0 %v2671_v16 }
 0x1c0   :  { %813 = vmatpush1.bf16.msra.mxu1 %v2675_v17 }
 0x1c1   :  { %814 = vmatprep.subr.bf16.mxu1 %v2678_v19 }
 0x1c2   :  { %774 = vmatpush1.bf16.msra.mxu0 %v2681_v21 }
 0x1c3   :  { %775 = vmatprep.subr.bf16.mxu0 %v2683_v23 }
 0x1c4   :  { %815 = vmatpush1.bf16.msra.mxu1 %v2687_v25 }
 0x1c5   :  { %816 = vmatprep.subr.bf16.mxu1 %v2690_v27 }
 0x1c6   :  { %776 = vmatpush1.bf16.msra.mxu0 %v2693_v29 }
 0x1c7   :  { %777 = vmatprep.subr.bf16.mxu0 %v2695_v31 }
 0x1c8   :  { %817 = vmatpush1.bf16.msra.mxu1 %v2699_v33 }
 0x1c9   :  { %818 = vmatprep.subr.bf16.mxu1 %v2702_v35 }
 0x1ca   :  { %778 = vmatpush1.bf16.msra.mxu0 %v2705_v37 }
 0x1cb   :  { %779 = vmatprep.subr.bf16.mxu0 %v2707_v42 }
 0x1cc   :  { %819 = vmatpush1.bf16.msra.mxu1 %v2711_v44 }
 0x1cd   :  { %820 = vmatprep.subr.bf16.mxu1 %v2714_v48 }
 0x1ce   :  { %780 = vmatpush1.bf16.msra.mxu0 %v2717_v52 }
 0x1cf   :  { %781 = vmatprep.subr.bf16.mxu0 %v2719_v56 }
 0x1d0   :  { %821 = vmatpush1.bf16.msra.mxu1 %v2723_v41 }
 0x1d1   :  { %822 = vmatprep.subr.bf16.mxu1 %v2726_v0 }
 0x1d2   :  { %782 = vmatpush1.bf16.msra.mxu0 %v2729_v38 }
 0x1d3   :  { %915 = vmatprep.subr.bf16.mxu0 %v2641_v60 }
 0x1d4   :  { %823 = vmatpush1.bf16.msra.mxu1 %v2733_v54 }
 0x1d5   :  { %956 = vmatprep.subr.bf16.mxu1 %v2649_v3 }
 0x288   :  { %v653_v39 = vpop.f32.mrb[0].mxu0 }
 0x289   :  { %v701_v58 = vadd.f32 %v653_v39, %v2573_v45  ;;  %v655_v12 = vpop.f32.mrb[1].mxu0 }
 0x28a   :  { %v702_v50 = vadd.f32 %v655_v12, %v2575_v47  ;;  %v657_v46 = vpop.f32.mrb[2].mxu0  ;;  %v694_v9 = vpop.f32.mrb[32].mxu1 }
 0x28b   :  { %v1999_v6 = vmul.f32 -1.442695, %v701_v58  ;;  %v658_v43 = vpop.f32.mrb[3].mxu0  ;;  %v696_v40 = vpop.f32.mrb[33].mxu1  ;;  %v703_v34 = vadd.f32 %v694_v9, %v2607_v18  ;;  %v581_v46 = vld [vmem:[#allocation12] sm:$0xff] }
 0x28c   :  { %v2000_v4 = vmul.f32 -1.442695, %v702_v50  ;;  %v698_v2 = vpop.f32.mrb[34].mxu1  ;;  %v704_v61 = vadd.f32 %v696_v40, %v2609_v20 }
 0x28d   :  { %2098 = vpow2.f32 %v1999_v6  ;;  %v699_v36 = vpop.f32.mrb[35].mxu1  ;;  %v2001_v63 = vmul.f32 -1.442695, %v703_v34 }
 0x28e   :  { %2100 = vpow2.f32 %v2000_v4 }
 0x28f   :  { %2102 = vpow2.f32 %v2001_v63 }
 0x290   :  { %2104 = vtanh.f32 %v704_v61 }
 0x297   :  { %v2099_v32 = vpop.eup %2098 }
 0x298   :  { %v2101_v45 = vpop.eup %2100  ;;  %v714_v39 = vadd.f32 1.0, %v2099_v32 }
 0x299   :  { %v715_v47 = vadd.f32 1.0, %v2101_v45  ;;  %v2103_v12 = vpop.eup %2102 }
 0x29a   :  { %2106 = vrcp.f32 %v714_v39  ;;  %v2105_v43 = vpop.eup %2104  ;;  %v716_v6 = vadd.f32 1.0, %v2103_v12 }
 0x29b   :  { %2108 = vrcp.f32 %v715_v47 }
 0x29c   :  { %2110 = vrcp.f32 %v716_v6 }
 0x2a4   :  { %v2107_v2 = vpop.eup %2106 }
 0x2a5   :  { %v2109_v36 = vpop.eup %2108  ;;  %v725_v4 = vmul.f32 %v2107_v2, %v2105_v43 }
 0x2a6   :  { %v724_v50 = vmul.f32 %v2109_v36, %v581_v46  ;;  %v2111_v63 = vpop.eup %2110 }
 0x2a8   :  { %v2777_v9 = vadd.f32 %v725_v4, %v724_v50 }
 0x2aa   :  { %2112 = vtanh.f32 %v2777_v9 }
 0x2b4   :  { %v2113_v18 = vpop.eup %2112 }
 0x2b5   :  { %v2780_v20 = vmul.f32 %v2113_v18, %v2111_v63 }
 0x2b7   :  { %v734_v61 = vpack.c.bf16 %v2780_v20, %v2780_v20 }
 0x2b9   :  { %800 = vmatmul.mubr.bf16.vlgmr.msra.gmra.mrb[4].mxu0 %v734_v61  ;;  %841 = vmatmul.mubr.bf16.vlgmr.msra.gmra.mrb[36].mxu1 %v734_v61 }
 0x2ba   :  { %916 = vmatpush1.bf16.msra.mxu0 %v2643_v62  ;;  %957 = vmatpush1.bf16.msra.mxu1 %v2655_v7 }
 0x2bb   :  { %917 = vmatprep.subr.bf16.mxu0 %v2645_v1  ;;  %958 = vmatprep.subr.bf16.mxu1 %v2657_v8 }
 0x2bc   :  { %947 = vmatprep.mubr.bf16.mxu0 %v3215_v14  ;;  %988 = vmatprep.mubr.bf16.mxu1 %v3215_v14 }
 0x2be   :  { %918 = vmatpush1.bf16.msra.mxu0 %v2652_v5  ;;  %959 = vmatpush1.bf16.msra.mxu1 %v2663_v11 }
 0x2bf   :  { %919 = vmatprep.subr.bf16.mxu0 %v2659_v10  ;;  %960 = vmatprep.subr.bf16.mxu1 %v2666_v13 }
 0x2c2   :  { %920 = vmatpush1.bf16.msra.mxu0 %v2669_v15  ;;  %961 = vmatpush1.bf16.msra.mxu1 %v2675_v17 }
 0x2c3   :  { %921 = vmatprep.subr.bf16.mxu0 %v2671_v16  ;;  %962 = vmatprep.subr.bf16.mxu1 %v2678_v19 }
 0x2c6   :  { %922 = vmatpush1.bf16.msra.mxu0 %v2681_v21  ;;  %963 = vmatpush1.bf16.msra.mxu1 %v2687_v25 }
 0x2c7   :  { %923 = vmatprep.subr.bf16.mxu0 %v2683_v23  ;;  %964 = vmatprep.subr.bf16.mxu1 %v2690_v27 }
 0x2ca   :  { %924 = vmatpush1.bf16.msra.mxu0 %v2693_v29  ;;  %965 = vmatpush1.bf16.msra.mxu1 %v2699_v33 }
 0x2cb   :  { %925 = vmatprep.subr.bf16.mxu0 %v2695_v31  ;;  %966 = vmatprep.subr.bf16.mxu1 %v2702_v35 }
 0x2ce   :  { %926 = vmatpush1.bf16.msra.mxu0 %v2705_v37  ;;  %967 = vmatpush1.bf16.msra.mxu1 %v2711_v44 }
 0x2cf   :  { %927 = vmatprep.subr.bf16.mxu0 %v2707_v42  ;;  %968 = vmatprep.subr.bf16.mxu1 %v2714_v48 }
 0x2d2   :  { %928 = vmatpush1.bf16.msra.mxu0 %v2717_v52  ;;  %969 = vmatpush1.bf16.msra.mxu1 %v2723_v41 }
 0x2d3   :  { %929 = vmatprep.subr.bf16.mxu0 %v2719_v56  ;;  %970 = vmatprep.subr.bf16.mxu1 %v2726_v0 }
 0x2d6   :  { %930 = vmatpush1.bf16.msra.mxu0 %v2729_v38  ;;  %971 = vmatpush1.bf16.msra.mxu1 %v2733_v54 }
 0x2d7   :  { %1063 = vmatprep.subr.bf16.mxu0 %v2641_v60  ;;  %1104 = vmatprep.subr.bf16.mxu1 %v2649_v3 }
 0x38c   :  { %v801_v32 = vpop.f32.mrb[4].mxu0  ;;  %v842_v34 = vpop.f32.mrb[36].mxu1 }
 0x38d   :  { %v849_v40 = vadd.f32 %v801_v32, %v2577_v49  ;;  %v803_v58 = vpop.f32.mrb[5].mxu0  ;;  %v844_v45 = vpop.f32.mrb[37].mxu1  ;;  %v851_v36 = vadd.f32 %v842_v34, %v2611_v22 }
 0x38e   :  { %v850_v39 = vadd.f32 %v803_v58, %v2579_v51  ;;  %v805_v47 = vpop.f32.mrb[6].mxu0  ;;  %v846_v12 = vpop.f32.mrb[38].mxu1  ;;  %v852_v4 = vadd.f32 %v844_v45, %v2613_v24 }
 0x38f   :  { %v2002_v43 = vmul.f32 -1.442695, %v849_v40  ;;  %v806_v46 = vpop.f32.mrb[7].mxu0  ;;  %v847_v2 = vpop.f32.mrb[39].mxu1  ;;  %v2004_v50 = vmul.f32 -1.442695, %v851_v36 }
 0x390   :  { %v2003_v6 = vmul.f32 -1.442695, %v850_v39 }
 0x391   :  { %2114 = vpow2.f32 %v2002_v43 }
 0x392   :  { %2116 = vpow2.f32 %v2003_v6 }
 0x393   :  { %2118 = vtanh.f32 %v852_v4 }
 0x394   :  { %2120 = vpow2.f32 %v2004_v50 }
 0x39b   :  { %v2115_v63 = vpop.eup %2114 }
 0x39c   :  { %v862_v18 = vadd.f32 1.0, %v2115_v63  ;;  %v2117_v49 = vpop.eup %2116 }
 0x39d   :  { %v863_v51 = vadd.f32 1.0, %v2117_v49  ;;  %v2119_v61 = vpop.eup %2118 }
 0x39e   :  { %2122 = vrcp.f32 %v862_v18  ;;  %v2121_v32 = vpop.eup %2120 }
 0x39f   :  { %2124 = vrcp.f32 %v863_v51  ;;  %v864_v47 = vadd.f32 1.0, %v2121_v32 }
 0x3a1   :  { %2126 = vrcp.f32 %v864_v47 }
 0x3a8   :  { %v2123_v40 = vpop.eup %2122 }
 0x3a9   :  { %v873_v58 = vmul.f32 %v2123_v40, %v2119_v61  ;;  %v2125_v39 = vpop.eup %2124 }
 0x3aa   :  { %v872_v12 = vmul.f32 %v2125_v39, %v2777_v9 }
 0x3ab   :  { %v2127_v24 = vpop.eup %2126 }
 0x3ac   :  { %v2823_v22 = vadd.f32 %v873_v58, %v872_v12 }
 0x3ae   :  { %2128 = vtanh.f32 %v2823_v22 }
 0x3b8   :  { %v2129_v34 = vpop.eup %2128 }
 0x3b9   :  { %v2826_v45 = vmul.f32 %v2129_v34, %v2127_v24 }
 0x3bb   :  { %v882_v43 = vpack.c.bf16 %v2826_v45, %v2826_v45 }
 0x3bd   :  { %948 = vmatmul.mubr.bf16.vlgmr.msra.gmra.mrb[8].mxu0 %v882_v43  ;;  %989 = vmatmul.mubr.bf16.vlgmr.msra.gmra.mrb[40].mxu1 %v882_v43 }
 0x3be   :  { %1064 = vmatpush1.bf16.msra.mxu0 %v2643_v62  ;;  %1105 = vmatpush1.bf16.msra.mxu1 %v2655_v7 }
 0x3bf   :  { %1065 = vmatprep.subr.bf16.mxu0 %v2645_v1  ;;  %1106 = vmatprep.subr.bf16.mxu1 %v2657_v8 }
 0x3c0   :  { %1095 = vmatprep.mubr.bf16.mxu0 %v3215_v14  ;;  %1136 = vmatprep.mubr.bf16.mxu1 %v3215_v14 }
 0x3c2   :  { %1066 = vmatpush1.bf16.msra.mxu0 %v2652_v5  ;;  %1107 = vmatpush1.bf16.msra.mxu1 %v2663_v11 }
 0x3c3   :  { %1067 = vmatprep.subr.bf16.mxu0 %v2659_v10  ;;  %1108 = vmatprep.subr.bf16.mxu1 %v2666_v13 }
 0x3c6   :  { %1068 = vmatpush1.bf16.msra.mxu0 %v2669_v15  ;;  %1109 = vmatpush1.bf16.msra.mxu1 %v2675_v17 }
 0x3c7   :  { %1069 = vmatprep.subr.bf16.mxu0 %v2671_v16  ;;  %1110 = vmatprep.subr.bf16.mxu1 %v2678_v19 }
 0x3ca   :  { %1070 = vmatpush1.bf16.msra.mxu0 %v2681_v21  ;;  %1111 = vmatpush1.bf16.msra.mxu1 %v2687_v25 }
 0x3cb   :  { %1071 = vmatprep.subr.bf16.mxu0 %v2683_v23  ;;  %1112 = vmatprep.subr.bf16.mxu1 %v2690_v27 }
 0x3ce   :  { %1072 = vmatpush1.bf16.msra.mxu0 %v2693_v29  ;;  %1113 = vmatpush1.bf16.msra.mxu1 %v2699_v33 }
 0x3cf   :  { %1073 = vmatprep.subr.bf16.mxu0 %v2695_v31  ;;  %1114 = vmatprep.subr.bf16.mxu1 %v2702_v35 }
 0x3d2   :  { %1074 = vmatpush1.bf16.msra.mxu0 %v2705_v37  ;;  %1115 = vmatpush1.bf16.msra.mxu1 %v2711_v44 }
 0x3d3   :  { %1075 = vmatprep.subr.bf16.mxu0 %v2707_v42  ;;  %1116 = vmatprep.subr.bf16.mxu1 %v2714_v48 }
 0x3d6   :  { %1076 = vmatpush1.bf16.msra.mxu0 %v2717_v52  ;;  %1117 = vmatpush1.bf16.msra.mxu1 %v2723_v41 }
 0x3d7   :  { %1077 = vmatprep.subr.bf16.mxu0 %v2719_v56  ;;  %1118 = vmatprep.subr.bf16.mxu1 %v2726_v0 }
 0x3da   :  { %1078 = vmatpush1.bf16.msra.mxu0 %v2729_v38  ;;  %1119 = vmatpush1.bf16.msra.mxu1 %v2733_v54 }
 0x3db   :  { %1211 = vmatprep.subr.bf16.mxu0 %v2641_v60  ;;  %1252 = vmatprep.subr.bf16.mxu1 %v2649_v3 }
 0x490   :  { %v949_v9 = vpop.f32.mrb[8].mxu0  ;;  %v990_v46 = vpop.f32.mrb[40].mxu1 }
 0x491   :  { %v997_v2 = vadd.f32 %v949_v9, %v2581_v53  ;;  %v951_v6 = vpop.f32.mrb[9].mxu0  ;;  %v992_v36 = vpop.f32.mrb[41].mxu1  ;;  %v999_v32 = vadd.f32 %v990_v46, %v2615_v26 }
 0x492   :  { %v998_v4 = vadd.f32 %v951_v6, %v2583_v55  ;;  %v953_v50 = vpop.f32.mrb[10].mxu0  ;;  %v994_v63 = vpop.f32.mrb[42].mxu1  ;;  %v1000_v40 = vadd.f32 %v992_v36, %v2617_v28 }
 0x493   :  { %v2005_v18 = vmul.f32 -1.442695, %v997_v2  ;;  %v954_v49 = vpop.f32.mrb[11].mxu0  ;;  %v995_v51 = vpop.f32.mrb[43].mxu1  ;;  %v2007_v58 = vmul.f32 -1.442695, %v999_v32 }
 0x494   :  { %v2006_v61 = vmul.f32 -1.442695, %v998_v4 }
 0x495   :  { %2130 = vpow2.f32 %v2005_v18 }
 0x496   :  { %2132 = vpow2.f32 %v2006_v61 }
 0x497   :  { %2134 = vtanh.f32 %v1000_v40 }
 0x498   :  { %2136 = vpow2.f32 %v2007_v58 }
 0x49f   :  { %v2131_v39 = vpop.eup %2130 }
 0x4a0   :  { %v1010_v47 = vadd.f32 1.0, %v2131_v39  ;;  %v2133_v53 = vpop.eup %2132 }
 0x4a1   :  { %v1011_v55 = vadd.f32 1.0, %v2133_v53  ;;  %v2135_v12 = vpop.eup %2134  ;;  %v3216_v53 = vld [vmem:[#allocation39_spill] sm:$0xff] }
 0x4a2   :  { %2138 = vrcp.f32 %v1010_v47  ;;  %v2137_v24 = vpop.eup %2136 }
 0x4a3   :  { %2140 = vrcp.f32 %v1011_v55  ;;  %v1012_v2 = vadd.f32 1.0, %v2137_v24 }
 0x4a5   :  { %2142 = vrcp.f32 %v1012_v2 }
 0x4ac   :  { %v2139_v34 = vpop.eup %2138 }
 0x4ad   :  { %v1021_v43 = vmul.f32 %v2139_v34, %v2135_v12  ;;  %v2141_v9 = vpop.eup %2140 }
 0x4ae   :  { %v1020_v6 = vmul.f32 %v2141_v9, %v2823_v22 }
 0x4af   :  { %v2143_v28 = vpop.eup %2142 }
 0x4b0   :  { %v2869_v26 = vadd.f32 %v1021_v43, %v1020_v6 }
 0x4b2   :  { %2144 = vtanh.f32 %v2869_v26 }
 0x4bc   :  { %v2145_v46 = vpop.eup %2144 }
 0x4bd   :  { %v2872_v36 = vmul.f32 %v2145_v46, %v2143_v28 }
 0x4bf   :  { %v1030_v4 = vpack.c.bf16 %v2872_v36, %v2872_v36 }
 0x4c1   :  { %1096 = vmatmul.mubr.bf16.vlgmr.msra.gmra.mrb[12].mxu0 %v1030_v4  ;;  %1137 = vmatmul.mubr.bf16.vlgmr.msra.gmra.mrb[44].mxu1 %v1030_v4 }
 0x4c2   :  { %1212 = vmatpush1.bf16.msra.mxu0 %v2643_v62  ;;  %1253 = vmatpush1.bf16.msra.mxu1 %v2655_v7 }
 0x4c3   :  { %1213 = vmatprep.subr.bf16.mxu0 %v2645_v1  ;;  %1254 = vmatprep.subr.bf16.mxu1 %v2657_v8 }
 0x4c4   :  { %1243 = vmatprep.mubr.bf16.mxu0 %v3215_v14  ;;  %1284 = vmatprep.mubr.bf16.mxu1 %v3215_v14 }
 0x4c6   :  { %1214 = vmatpush1.bf16.msra.mxu0 %v2652_v5  ;;  %1255 = vmatpush1.bf16.msra.mxu1 %v2663_v11 }
 0x4c7   :  { %1215 = vmatprep.subr.bf16.mxu0 %v2659_v10  ;;  %1256 = vmatprep.subr.bf16.mxu1 %v2666_v13 }
 0x4ca   :  { %1216 = vmatpush1.bf16.msra.mxu0 %v2669_v15  ;;  %1257 = vmatpush1.bf16.msra.mxu1 %v2675_v17 }
 0x4cb   :  { %1217 = vmatprep.subr.bf16.mxu0 %v2671_v16  ;;  %1258 = vmatprep.subr.bf16.mxu1 %v2678_v19 }
 0x4ce   :  { %1218 = vmatpush1.bf16.msra.mxu0 %v2681_v21  ;;  %1259 = vmatpush1.bf16.msra.mxu1 %v2687_v25 }
 0x4cf   :  { %1219 = vmatprep.subr.bf16.mxu0 %v2683_v23  ;;  %1260 = vmatprep.subr.bf16.mxu1 %v2690_v27 }
 0x4d2   :  { %1220 = vmatpush1.bf16.msra.mxu0 %v2693_v29  ;;  %1261 = vmatpush1.bf16.msra.mxu1 %v2699_v33 }
 0x4d3   :  { %1221 = vmatprep.subr.bf16.mxu0 %v2695_v31  ;;  %1262 = vmatprep.subr.bf16.mxu1 %v2702_v35 }
 0x4d6   :  { %1222 = vmatpush1.bf16.msra.mxu0 %v2705_v37  ;;  %1263 = vmatpush1.bf16.msra.mxu1 %v2711_v44 }
 0x4d7   :  { %1223 = vmatprep.subr.bf16.mxu0 %v2707_v42  ;;  %1264 = vmatprep.subr.bf16.mxu1 %v2714_v48 }
 0x4da   :  { %1224 = vmatpush1.bf16.msra.mxu0 %v2717_v52  ;;  %1265 = vmatpush1.bf16.msra.mxu1 %v2723_v41 }
 0x4db   :  { %1225 = vmatprep.subr.bf16.mxu0 %v2719_v56  ;;  %1266 = vmatprep.subr.bf16.mxu1 %v2726_v0 }
 0x4de   :  { %1226 = vmatpush1.bf16.msra.mxu0 %v2729_v38  ;;  %1267 = vmatpush1.bf16.msra.mxu1 %v2733_v54 }
 0x4df   :  { %1359 = vmatprep.subr.bf16.mxu0 %v2641_v60  ;;  %1400 = vmatprep.subr.bf16.mxu1 %v2649_v3 }
 0x594   :  { %v1097_v22 = vpop.f32.mrb[12].mxu0  ;;  %v1138_v50 = vpop.f32.mrb[44].mxu1 }
 0x595   :  { %v1145_v63 = vadd.f32 %v1097_v22, %v2585_v57  ;;  %v1099_v18 = vpop.f32.mrb[13].mxu0  ;;  %v1140_v49 = vpop.f32.mrb[45].mxu1  ;;  %v1147_v60 = vadd.f32 %v1138_v50, %v2619_v30 }
 0x596   :  { %v1146_v51 = vadd.f32 %v1099_v18, %v2587_v59  ;;  %v1101_v61 = vpop.f32.mrb[14].mxu0  ;;  %v1142_v32 = vpop.f32.mrb[46].mxu1  ;;  %v1148_v3 = vadd.f32 %v1140_v49, %v3216_v53  ;;  %v2986_v53 = vld [vmem:[#allocation4 + $0x20] sm:$0xff] }
 0x597   :  { %v2008_v40 = vmul.f32 -1.442695, %v1145_v63  ;;  %v1102_v58 = vpop.f32.mrb[15].mxu0  ;;  %v1143_v39 = vpop.f32.mrb[47].mxu1  ;;  %v2010_v55 = vmul.f32 -1.442695, %v1147_v60 }
 0x598   :  { %v2009_v47 = vmul.f32 -1.442695, %v1146_v51  ;;  %v2968_v32 = vld [vmem:[#allocation4 + $0x8] sm:$0xff]  ;;  %v2974_v58 = vld [vmem:[#allocation4] sm:$0xff]  ;;  %v2976_v39 = vld [vmem:[#allocation4 + $0x10] sm:$0xff] }
 0x599   :  { %2146 = vpow2.f32 %v2008_v40  ;;  %v2970_v40 = vld [vmem:[#allocation4 + $0x18] sm:$0xff] }
 0x59a   :  { %2148 = vpow2.f32 %v2009_v47  ;;  %v2980_v47 = vld [vmem:[#allocation4 + $0x28] sm:$0xff]  ;;  %v2982_v60 = vld [vmem:[#allocation4 + $0x38] sm:$0xff] }
 0x59b   :  { %2150 = vtanh.f32 %v1148_v3  ;;  %v2988_v3 = vld [vmem:[#allocation4 + $0x30] sm:$0xff] }
 0x59c   :  { %2152 = vpow2.f32 %v2010_v55  ;;  %v2992_v55 = vld [vmem:[#allocation4 + $0x48] sm:$0xff] }
 0x5a3   :  { %v2147_v12 = vpop.eup %2146 }
 0x5a4   :  { %v1158_v24 = vadd.f32 1.0, %v2147_v12  ;;  %v2149_v57 = vpop.eup %2148  ;;  %v2994_v12 = vld [vmem:[#allocation4 + $0x58] sm:$0xff] }
 0x5a5   :  { %v1159_v59 = vadd.f32 1.0, %v2149_v57  ;;  %v2151_v34 = vpop.eup %2150  ;;  %v3000_v57 = vld [vmem:[#allocation4 + $0x50] sm:$0xff] }
 0x5a6   :  { %2154 = vrcp.f32 %v1158_v24  ;;  %v2153_v43 = vpop.eup %2152  ;;  %v2998_v24 = vld [vmem:[#allocation4 + $0x40] sm:$0xff] }
 0x5a7   :  { %2156 = vrcp.f32 %v1159_v59  ;;  %v1160_v28 = vadd.f32 1.0, %v2153_v43  ;;  %v3004_v59 = vld [vmem:[#allocation4 + $0x68] sm:$0xff]  ;;  %v3010_v43 = vld [vmem:[#allocation4 + $0x60] sm:$0xff] }
 0x5a9   :  { %2158 = vrcp.f32 %v1160_v28  ;;  %v3022_v28 = vld [vmem:[#allocation4 + $0x80] sm:$0xff] }
 0x5b0   :  { %v2155_v9 = vpop.eup %2154 }
 0x5b1   :  { %v1169_v2 = vmul.f32 %v2155_v9, %v2151_v34  ;;  %v2157_v6 = vpop.eup %2156  ;;  %v3006_v34 = vld [vmem:[#allocation4 + $0x78] sm:$0xff]  ;;  %v3012_v9 = vld [vmem:[#allocation4 + $0x70] sm:$0xff] }
 0x5b2   :  { %v1168_v46 = vmul.f32 %v2157_v6, %v2869_v26  ;;  %v3018_v6 = vld [vmem:[#allocation4 + $0x98] sm:$0xff] }
 0x5b3   :  { %v2159_v4 = vpop.eup %2158 }
 0x5b4   :  { %v2915_v30 = vadd.f32 %v1169_v2, %v1168_v46  ;;  %v3016_v2 = vld [vmem:[#allocation4 + $0x88] sm:$0xff]  ;;  %v3024_v46 = vld [vmem:[#allocation4 + $0x90] sm:$0xff] }
 0x5b6   :  { %2160 = vtanh.f32 %v2915_v30 }
 0x5c0   :  { %v2161_v22 = vpop.eup %2160 }
 0x5c1   :  { %v2918_v50 = vmul.f32 %v2161_v22, %v2159_v4  ;;  %v3030_v4 = vld [vmem:[#allocation4 + $0xb8] sm:$0xff]  ;;  %v3034_v22 = vld [vmem:[#allocation4 + $0xa0] sm:$0xff] }
 0x5c3   :  { %v1178_v63 = vpack.c.bf16 %v2918_v50, %v2918_v50 }
 0x5c5   :  { %1244 = vmatmul.mubr.bf16.vlgmr.msra.gmra.mrb[16].mxu0 %v1178_v63  ;;  %1285 = vmatmul.mubr.bf16.vlgmr.msra.gmra.mrb[48].mxu1 %v1178_v63  ;;  %v3036_v63 = vld [vmem:[#allocation4 + $0xb0] sm:$0xff] }
 0x5c6   :  { %1360 = vmatpush1.bf16.msra.mxu0 %v2643_v62  ;;  %1401 = vmatpush1.bf16.msra.mxu1 %v2655_v7 }
 0x5c7   :  { %1361 = vmatprep.subr.bf16.mxu0 %v2645_v1  ;;  %1402 = vmatprep.subr.bf16.mxu1 %v2657_v8 }
 0x5c8   :  { %1391 = vmatprep.mubr.bf16.mxu0 %v3215_v14  ;;  %1432 = vmatprep.mubr.bf16.mxu1 %v3215_v14 }
 0x5ca   :  { %1362 = vmatpush1.bf16.msra.mxu0 %v2652_v5  ;;  %1403 = vmatpush1.bf16.msra.mxu1 %v2663_v11  ;;  %v3217_v5 = vld [vmem:[#allocation31_spill] sm:$0xff]  ;;  %v3218_v11 = vld [vmem:[#allocation32_spill] sm:$0xff] }
 0x5cb   :  { %1363 = vmatprep.subr.bf16.mxu0 %v2659_v10  ;;  %1404 = vmatprep.subr.bf16.mxu1 %v2666_v13 }
 0x5ce   :  { %1364 = vmatpush1.bf16.msra.mxu0 %v2669_v15  ;;  %1405 = vmatpush1.bf16.msra.mxu1 %v2675_v17 }
 0x5cf   :  { %1365 = vmatprep.subr.bf16.mxu0 %v2671_v16  ;;  %1406 = vmatprep.subr.bf16.mxu1 %v2678_v19 }
 0x5d2   :  { %1366 = vmatpush1.bf16.msra.mxu0 %v2681_v21  ;;  %1407 = vmatpush1.bf16.msra.mxu1 %v2687_v25 }
 0x5d3   :  { %1367 = vmatprep.subr.bf16.mxu0 %v2683_v23  ;;  %1408 = vmatprep.subr.bf16.mxu1 %v2690_v27  ;;  %v3220_v23 = vld [vmem:[#allocation41_spill] sm:$0xff] }
 0x5d6   :  { %1368 = vmatpush1.bf16.msra.mxu0 %v2693_v29  ;;  %1409 = vmatpush1.bf16.msra.mxu1 %v2699_v33 }
 0x5d7   :  { %1369 = vmatprep.subr.bf16.mxu0 %v2695_v31  ;;  %1410 = vmatprep.subr.bf16.mxu1 %v2702_v35 }
 0x5da   :  { %1370 = vmatpush1.bf16.msra.mxu0 %v2705_v37  ;;  %1411 = vmatpush1.bf16.msra.mxu1 %v2711_v44 }
 0x5db   :  { %1371 = vmatprep.subr.bf16.mxu0 %v2707_v42  ;;  %1412 = vmatprep.subr.bf16.mxu1 %v2714_v48 }
 0x5de   :  { %1372 = vmatpush1.bf16.msra.mxu0 %v2717_v52  ;;  %1413 = vmatpush1.bf16.msra.mxu1 %v2723_v41 }
 0x5df   :  { %1373 = vmatprep.subr.bf16.mxu0 %v2719_v56  ;;  %1414 = vmatprep.subr.bf16.mxu1 %v2726_v0  ;;  %v3219_v0 = vld [vmem:[#allocation40_spill] sm:$0xff] }
 0x5e2   :  { %1374 = vmatpush1.bf16.msra.mxu0 %v2729_v38  ;;  %1415 = vmatpush1.bf16.msra.mxu1 %v2733_v54 }
 0x5e3   :  { %1507 = vmatprep.subr.bf16.mxu0 %v2968_v32  ;;  %1548 = vmatprep.subr.bf16.mxu1 %v2970_v40 }
 0x698   :  { %v1245_v62 = vpop.f32.mrb[16].mxu0  ;;  %v1286_v1 = vpop.f32.mrb[48].mxu1 }
 0x699   :  { %v1293_v7 = vadd.f32 %v1245_v62, %v3217_v5  ;;  %v1247_v8 = vpop.f32.mrb[17].mxu0  ;;  %v1288_v10 = vpop.f32.mrb[49].mxu1  ;;  %v1295_v38 = vadd.f32 %v1286_v1, %v3219_v0  ;;  %v3038_v62 = vld [vmem:[#allocation4 + $0xc8] sm:$0xff]  ;;  %v3040_v1 = vld [vmem:[#allocation4 + $0xd8] sm:$0xff]  ;;  %v3046_v5 = vld [vmem:[#allocation4 + $0xc0] sm:$0xff] }
 0x69a   :  { %v1294_v13 = vadd.f32 %v1247_v8, %v3218_v11  ;;  %v1249_v15 = vpop.f32.mrb[18].mxu0  ;;  %v1290_v16 = vpop.f32.mrb[50].mxu1  ;;  %v1296_v54 = vadd.f32 %v1288_v10, %v3220_v23  ;;  %v3050_v8 = vld [vmem:[#allocation4 + $0xe8] sm:$0xff]  ;;  %v3052_v10 = vld [vmem:[#allocation4 + $0xf8] sm:$0xff]  ;;  %v3058_v11 = vld [vmem:[#allocation4 + $0xe0] sm:$0xff] }
 0x69b   :  { %v2011_v17 = vmul.f32 -1.442695, %v1293_v7  ;;  %v1250_v41 = vpop.f32.mrb[19].mxu0  ;;  %v1291_v19 = vpop.f32.mrb[51].mxu1  ;;  %v2013_v25 = vmul.f32 -1.442695, %v1295_v38 }
 0x69c   :  { %v2012_v21 = vmul.f32 -1.442695, %v1294_v13  ;;  %v3048_v7 = vld [vmem:[#allocation4 + $0xd0] sm:$0xff]  ;;  %v3222_v0 = vld [vmem:[#allocation34_spill] sm:$0xff] }
 0x69d   :  { %2162 = vpow2.f32 %v2011_v17  ;;  %v3060_v13 = vld [vmem:[#allocation4 + $0xf0] sm:$0xff]  ;;  %v3221_v17 = vld [vmem:[#allocation33_spill] sm:$0xff] }
 0x69e   :  { %2164 = vpow2.f32 %v2012_v21 }
 0x69f   :  { %2166 = vtanh.f32 %v1296_v54 }
 0x6a0   :  { %2168 = vpow2.f32 %v2013_v25 }
 0x6a7   :  { %v2163_v27 = vpop.eup %2162 }
 0x6a8   :  { %v1306_v29 = vadd.f32 1.0, %v2163_v27  ;;  %v2165_v31 = vpop.eup %2164 }
 0x6a9   :  { %v1307_v33 = vadd.f32 1.0, %v2165_v31  ;;  %v2167_v35 = vpop.eup %2166 }
 0x6aa   :  { %2170 = vrcp.f32 %v1306_v29  ;;  %v2169_v37 = vpop.eup %2168 }
 0x6ab   :  { %2172 = vrcp.f32 %v1307_v33  ;;  %v1308_v52 = vadd.f32 1.0, %v2169_v37  ;;  %v3223_v33 = vld [vmem:[#allocation42_spill] sm:$0xff]  ;;  %v3224_v37 = vld [vmem:[#allocation43_spill] sm:$0xff] }
 0x6ad   :  { %2174 = vrcp.f32 %v1308_v52 }
 0x6b4   :  { %v2171_v42 = vpop.eup %2170 }
 0x6b5   :  { %v1317_v44 = vmul.f32 %v2171_v42, %v2167_v35  ;;  %v2173_v48 = vpop.eup %2172 }
 0x6b6   :  { %v1316_v56 = vmul.f32 %v2173_v48, %v2915_v30  ;;  %v3028_v30 = vld [vmem:[#allocation4 + $0xa8] sm:$0xff] }
 0x6b7   :  { %v2175_v18 = vpop.eup %2174 }
 0x6b8   :  { %v2959_v26 = vadd.f32 %v1317_v44, %v1316_v56 }
 0x6ba   :  { %2176 = vtanh.f32 %v2959_v26 }
 0x6c4   :  { %v2177_v49 = vpop.eup %2176 }
 0x6c5   :  { %v2962_v51 = vmul.f32 %v2177_v49, %v2175_v18 }
 0x6c7   :  { %v1326_v61 = vpack.c.bf16 %v2962_v51, %v2962_v51 }
 0x6c9   :  { %1392 = vmatmul.mubr.bf16.vlgmr.msra.gmra.mrb[20].mxu0 %v1326_v61  ;;  %1433 = vmatmul.mubr.bf16.vlgmr.msra.gmra.mrb[52].mxu1 %v1326_v61 }
 0x6ca   :  { %1539 = vmatprep.mubr.bf16.mxu0 %v3215_v14  ;;  %1580 = vmatprep.mubr.bf16.mxu1 %v3215_v14 }
 0x6cb   :  { %1508 = vmatpush1.bf16.msra.mxu0 %v2974_v58  ;;  %1549 = vmatpush1.bf16.msra.mxu1 %v2976_v39 }
 0x6cc   :  { %1509 = vmatprep.subr.bf16.mxu0 %v2980_v47  ;;  %1550 = vmatprep.subr.bf16.mxu1 %v2982_v60 }
 0x6cf   :  { %1510 = vmatpush1.bf16.msra.mxu0 %v2986_v53  ;;  %1551 = vmatpush1.bf16.msra.mxu1 %v2988_v3 }
 0x6d0   :  { %1511 = vmatprep.subr.bf16.mxu0 %v2992_v55  ;;  %1552 = vmatprep.subr.bf16.mxu1 %v2994_v12 }
 0x6d3   :  { %1512 = vmatpush1.bf16.msra.mxu0 %v2998_v24  ;;  %1553 = vmatpush1.bf16.msra.mxu1 %v3000_v57 }
 0x6d4   :  { %1513 = vmatprep.subr.bf16.mxu0 %v3004_v59  ;;  %1554 = vmatprep.subr.bf16.mxu1 %v3006_v34 }
 0x6d7   :  { %1514 = vmatpush1.bf16.msra.mxu0 %v3010_v43  ;;  %1555 = vmatpush1.bf16.msra.mxu1 %v3012_v9 }
 0x6d8   :  { %1515 = vmatprep.subr.bf16.mxu0 %v3016_v2  ;;  %1556 = vmatprep.subr.bf16.mxu1 %v3018_v6 }
 0x6db   :  { %1516 = vmatpush1.bf16.msra.mxu0 %v3022_v28  ;;  %1557 = vmatpush1.bf16.msra.mxu1 %v3024_v46 }
 0x6dc   :  { %1517 = vmatprep.subr.bf16.mxu0 %v3028_v30  ;;  %1558 = vmatprep.subr.bf16.mxu1 %v3030_v4 }
 0x6df   :  { %1518 = vmatpush1.bf16.msra.mxu0 %v3034_v22  ;;  %1559 = vmatpush1.bf16.msra.mxu1 %v3036_v63 }
 0x6e0   :  { %1519 = vmatprep.subr.bf16.mxu0 %v3038_v62  ;;  %1560 = vmatprep.subr.bf16.mxu1 %v3040_v1 }
 0x6e3   :  { %1520 = vmatpush1.bf16.msra.mxu0 %v3046_v5  ;;  %1561 = vmatpush1.bf16.msra.mxu1 %v3048_v7 }
 0x6e4   :  { %1521 = vmatprep.subr.bf16.mxu0 %v3050_v8  ;;  %1562 = vmatprep.subr.bf16.mxu1 %v3052_v10 }
 0x6e7   :  { %1522 = vmatpush1.bf16.msra.mxu0 %v3058_v11  ;;  %1563 = vmatpush1.bf16.msra.mxu1 %v3060_v13 }
 0x6e8   :  { %1655 = vmatprep.subr.bf16.mxu0 %v2968_v32  ;;  %1696 = vmatprep.subr.bf16.mxu1 %v2970_v40 }
 0x79c   :  { %v1393_v15 = vpop.f32.mrb[20].mxu0  ;;  %v1434_v16 = vpop.f32.mrb[52].mxu1 }
 0x79d   :  { %v1441_v41 = vadd.f32 %v1393_v15, %v3221_v17  ;;  %v1395_v19 = vpop.f32.mrb[21].mxu0  ;;  %v1436_v21 = vpop.f32.mrb[53].mxu1  ;;  %v1443_v35 = vadd.f32 %v1434_v16, %v3223_v33  ;;  %v3229_v33 = vld [vmem:[#allocation37_spill] sm:$0xff] }
 0x79e   :  { %v1442_v38 = vadd.f32 %v1395_v19, %v3222_v0  ;;  %v1397_v23 = vpop.f32.mrb[22].mxu0  ;;  %v1438_v54 = vpop.f32.mrb[54].mxu1  ;;  %v1444_v42 = vadd.f32 %v1436_v21, %v3224_v37 }
 0x79f   :  { %v2014_v25 = vmul.f32 -1.442695, %v1441_v41  ;;  %v1398_v27 = vpop.f32.mrb[23].mxu0  ;;  %v1439_v29 = vpop.f32.mrb[55].mxu1  ;;  %v2016_v44 = vmul.f32 -1.442695, %v1443_v35 }
 0x7a0   :  { %v2015_v31 = vmul.f32 -1.442695, %v1442_v38 }
 0x7a1   :  { %2178 = vpow2.f32 %v2014_v25 }
 0x7a2   :  { %2180 = vpow2.f32 %v2015_v31 }
 0x7a3   :  { %2182 = vtanh.f32 %v1444_v42 }
 0x7a4   :  { %2184 = vpow2.f32 %v2016_v44  ;;  %v3230_v44 = vld [vmem:[#allocation38_spill] sm:$0xff] }
 0x7ab   :  { %v2179_v48 = vpop.eup %2178 }
 0x7ac   :  { %v1454_v52 = vadd.f32 1.0, %v2179_v48  ;;  %v2181_v56 = vpop.eup %2180 }
 0x7ad   :  { %v1455_v18 = vadd.f32 1.0, %v2181_v56  ;;  %v2183_v49 = vpop.eup %2182 }
 0x7ae   :  { %2186 = vrcp.f32 %v1454_v52  ;;  %v2185_v61 = vpop.eup %2184 }
 0x7af   :  { %2188 = vrcp.f32 %v1455_v18  ;;  %v1456_v17 = vadd.f32 1.0, %v2185_v61 }
 0x7b1   :  { %2190 = vrcp.f32 %v1456_v17  ;;  %v3232_v17 = vld [vmem:[#allocation47_spill] sm:$0xff] }
 0x7b8   :  { %v2187_v32 = vpop.eup %2186 }
 0x7b9   :  { %v1465_v40 = vmul.f32 %v2187_v32, %v2183_v49  ;;  %v2189_v15 = vpop.eup %2188 }
 0x7ba   :  { %v1464_v41 = vmul.f32 %v2189_v15, %v2959_v26 }
 0x7bb   :  { %v2191_v19 = vpop.eup %2190 }
 0x7bc   :  { %v3071_v16 = vadd.f32 %v1465_v40, %v1464_v41  ;;  %v3231_v40 = vld [vmem:[#allocation46_spill] sm:$0xff] }
 0x7be   :  { %2192 = vtanh.f32 %v3071_v16 }
 0x7c8   :  { %v2193_v21 = vpop.eup %2192 }
 0x7c9   :  { %v3074_v0 = vmul.f32 %v2193_v21, %v2191_v19 }
 0x7cb   :  { %v1474_v38 = vpack.c.bf16 %v3074_v0, %v3074_v0 }
 0x7cd   :  { %1540 = vmatmul.mubr.bf16.vlgmr.msra.gmra.mrb[24].mxu0 %v1474_v38  ;;  %1581 = vmatmul.mubr.bf16.vlgmr.msra.gmra.mrb[56].mxu1 %v1474_v38 }
 0x7ce   :  { %1656 = vmatpush1.bf16.msra.mxu0 %v2974_v58  ;;  %1697 = vmatpush1.bf16.msra.mxu1 %v2976_v39  ;;  %v3225_v39 = vld [vmem:[#allocation35_spill] sm:$0xff] }
 0x7cf   :  { %1657 = vmatprep.subr.bf16.mxu0 %v2980_v47  ;;  %1698 = vmatprep.subr.bf16.mxu1 %v2982_v60 }
 0x7d0   :  { %1687 = vmatprep.mubr.bf16.mxu0 %v3215_v14  ;;  %1728 = vmatprep.mubr.bf16.mxu1 %v3215_v14 }
 0x7d2   :  { %1658 = vmatpush1.bf16.msra.mxu0 %v2986_v53  ;;  %1699 = vmatpush1.bf16.msra.mxu1 %v2988_v3  ;;  %v3226_v3 = vld [vmem:[#allocation36_spill] sm:$0xff] }
 0x7d3   :  { %1659 = vmatprep.subr.bf16.mxu0 %v2992_v55  ;;  %1700 = vmatprep.subr.bf16.mxu1 %v2994_v12 }
 0x7d6   :  { %1660 = vmatpush1.bf16.msra.mxu0 %v2998_v24  ;;  %1701 = vmatpush1.bf16.msra.mxu1 %v3000_v57 }
 0x7d7   :  { %1661 = vmatprep.subr.bf16.mxu0 %v3004_v59  ;;  %1702 = vmatprep.subr.bf16.mxu1 %v3006_v34 }
 0x7da   :  { %1662 = vmatpush1.bf16.msra.mxu0 %v3010_v43  ;;  %1703 = vmatpush1.bf16.msra.mxu1 %v3012_v9  ;;  %v3227_v9 = vld [vmem:[#allocation44_spill] sm:$0xff] }
 0x7db   :  { %1663 = vmatprep.subr.bf16.mxu0 %v3016_v2  ;;  %1704 = vmatprep.subr.bf16.mxu1 %v3018_v6  ;;  %v3228_v6 = vld [vmem:[#allocation45_spill] sm:$0xff] }
 0x7de   :  { %1664 = vmatpush1.bf16.msra.mxu0 %v3022_v28  ;;  %1705 = vmatpush1.bf16.msra.mxu1 %v3024_v46 }
 0x7df   :  { %1665 = vmatprep.subr.bf16.mxu0 %v3028_v30  ;;  %1706 = vmatprep.subr.bf16.mxu1 %v3030_v4 }
 0x7e2   :  { %1666 = vmatpush1.bf16.msra.mxu0 %v3034_v22  ;;  %1707 = vmatpush1.bf16.msra.mxu1 %v3036_v63 }
 0x7e3   :  { %1667 = vmatprep.subr.bf16.mxu0 %v3038_v62  ;;  %1708 = vmatprep.subr.bf16.mxu1 %v3040_v1 }
 0x7e6   :  { %1668 = vmatpush1.bf16.msra.mxu0 %v3046_v5  ;;  %1709 = vmatpush1.bf16.msra.mxu1 %v3048_v7 }
 0x7e7   :  { %1669 = vmatprep.subr.bf16.mxu0 %v3050_v8  ;;  %1710 = vmatprep.subr.bf16.mxu1 %v3052_v10 }
 0x7ea   :  { %1670 = vmatpush1.bf16.msra.mxu0 %v3058_v11  ;;  %1711 = vmatpush1.bf16.msra.mxu1 %v3060_v13 }
 0x8a0   :  { %v1541_v26 = vpop.f32.mrb[24].mxu0  ;;  %v1582_v58 = vpop.f32.mrb[56].mxu1 }
 0x8a1   :  { %v1589_v47 = vadd.f32 %v1541_v26, %v3225_v39  ;;  %v1543_v60 = vpop.f32.mrb[25].mxu0  ;;  %v1584_v53 = vpop.f32.mrb[57].mxu1  ;;  %v1591_v2 = vadd.f32 %v1582_v58, %v3227_v9 }
 0x8a2   :  { %v1590_v55 = vadd.f32 %v1543_v60, %v3226_v3  ;;  %v1545_v12 = vpop.f32.mrb[26].mxu0  ;;  %v1586_v24 = vpop.f32.mrb[58].mxu1  ;;  %v1592_v28 = vadd.f32 %v1584_v53, %v3228_v6 }
 0x8a3   :  { %v2017_v57 = vmul.f32 -1.442695, %v1589_v47  ;;  %v1546_v59 = vpop.f32.mrb[27].mxu0  ;;  %v1587_v34 = vpop.f32.mrb[59].mxu1  ;;  %v2019_v46 = vmul.f32 -1.442695, %v1591_v2 }
 0x8a4   :  { %v2018_v43 = vmul.f32 -1.442695, %v1590_v55 }
 0x8a5   :  { %2194 = vpow2.f32 %v2017_v57 }
 0x8a6   :  { %2196 = vpow2.f32 %v2018_v43 }
 0x8a7   :  { %2198 = vtanh.f32 %v1592_v28 }
 0x8a8   :  { %2200 = vpow2.f32 %v2019_v46 }
 0x8af   :  { %v2195_v30 = vpop.eup %2194 }
 0x8b0   :  { %v1602_v4 = vadd.f32 1.0, %v2195_v30  ;;  %v2197_v22 = vpop.eup %2196 }
 0x8b1   :  { %v1603_v63 = vadd.f32 1.0, %v2197_v22  ;;  %v2199_v62 = vpop.eup %2198 }
 0x8b2   :  { %2202 = vrcp.f32 %v1602_v4  ;;  %v2201_v1 = vpop.eup %2200 }
 0x8b3   :  { %2204 = vrcp.f32 %v1603_v63  ;;  %v1604_v10 = vadd.f32 1.0, %v2201_v1 }
 0x8b5   :  { %2206 = vrcp.f32 %v1604_v10 }
 0x8bc   :  { %v2203_v5 = vpop.eup %2202 }
 0x8bd   :  { %v1613_v7 = vmul.f32 %v2203_v5, %v2199_v62  ;;  %v2205_v8 = vpop.eup %2204 }
 0x8be   :  { %v1612_v11 = vmul.f32 %v2205_v8, %v3071_v16 }
 0x8bf   :  { %v2207_v23 = vpop.eup %2206 }
 0x8c0   :  { %v1614_v13 = vadd.f32 %v1613_v7, %v1612_v11 }
 0x8c2   :  { %2208 = vtanh.f32 %v1614_v13 }
 0x8cc   :  { %v2209_v54 = vpop.eup %2208 }
 0x8cd   :  { %v3115_v25 = vmul.f32 %v2209_v54, %v2207_v23 }
 0x8cf   :  { %v1622_v27 = vpack.c.bf16 %v3115_v25, %v3115_v25 }
 0x8d1   :  { %1688 = vmatmul.mubr.bf16.vlgmr.msra.gmra.mrb[28].mxu0 %v1622_v27  ;;  %1729 = vmatmul.mubr.bf16.vlgmr.msra.gmra.mrb[60].mxu1 %v1622_v27 }
 0x9a4   :  { %v1689_v29 = vpop.f32.mrb[28].mxu0  ;;  %v1730_v31 = vpop.f32.mrb[60].mxu1 }
 0x9a5   :  { %v1737_v35 = vadd.f32 %v1689_v29, %v3229_v33  ;;  %v1691_v37 = vpop.f32.mrb[29].mxu0  ;;  %v1732_v42 = vpop.f32.mrb[61].mxu1  ;;  %v1739_v15 = vadd.f32 %v1730_v31, %v3231_v40 }
 0x9a6   :  { %v1738_v48 = vadd.f32 %v1691_v37, %v3230_v44  ;;  %v1693_v52 = vpop.f32.mrb[30].mxu0  ;;  %v1734_v56 = vpop.f32.mrb[62].mxu1  ;;  %v1740_v41 = vadd.f32 %v1732_v42, %v3232_v17 }
 0x9a7   :  { %v2020_v18 = vmul.f32 -1.442695, %v1737_v35  ;;  %v1694_v49 = vpop.f32.mrb[31].mxu0  ;;  %v1735_v61 = vpop.f32.mrb[63].mxu1  ;;  %v2022_v16 = vmul.f32 -1.442695, %v1739_v15 }
 0x9a8   :  { %v2021_v32 = vmul.f32 -1.442695, %v1738_v48 }
 0x9a9   :  { %2210 = vpow2.f32 %v2020_v18 }
 0x9aa   :  { %2212 = vpow2.f32 %v2021_v32 }
 0x9ab   :  { %2214 = vtanh.f32 %v1740_v41 }
 0x9ac   :  { %2216 = vpow2.f32 %v2022_v16 }
 0x9b3   :  { %v2211_v19 = vpop.eup %2210 }
 0x9b4   :  { %v1750_v21 = vadd.f32 1.0, %v2211_v19  ;;  %v2213_v38 = vpop.eup %2212 }
 0x9b5   :  { %v1751_v26 = vadd.f32 1.0, %v2213_v38  ;;  %v2215_v58 = vpop.eup %2214 }
 0x9b6   :  { %2218 = vrcp.f32 %v1750_v21  ;;  %v2217_v39 = vpop.eup %2216 }
 0x9b7   :  { %2220 = vrcp.f32 %v1751_v26  ;;  %v1752_v3 = vadd.f32 1.0, %v2217_v39 }
 0x9b9   :  { %2222 = vrcp.f32 %v1752_v3 }
 0x9c0   :  { %v2219_v47 = vpop.eup %2218 }
 0x9c1   :  { %v1761_v60 = vmul.f32 %v2219_v47, %v2215_v58  ;;  %v2221_v53 = vpop.eup %2220 }
 0x9c2   :  { %v1760_v55 = vmul.f32 %v2221_v53, %v1614_v13 }
 0x9c3   :  { %v2223_v24 = vpop.eup %2222 }
 0x9c4   :  { %v1762_v12 = vadd.f32 %v1761_v60, %v1760_v55 }
 0x9c6   :  { %2224 = vtanh.f32 %v1762_v12  ;;  %1767 = vst [vmem:[#allocation18] sm:$0xff] %v1762_v12 }
 0x9d0   :  { %v2225_v57 = vpop.eup %2224 }
 0x9d1   :  { %v1764_v59 = vmul.f32 %v2225_v57, %v2223_v24 }
 0x9d3   :  { %1766 = vst [vmem:[#allocation16] sm:$0xff] %v1764_v59 }
 0x9d4   :  { %2388 = dma.done.wait [#allocation6 + $0x1], 2048 }
 0x9d5   :  { %2389 = vsyncadd [#allocation6 + $0x1], 4294965248  ;;  %1843 = vmatprep.mubr.bf16.mxu0 %v3215_v14  ;;  %v1784_v34 = vld [vmem:[#allocation5 + $0x8] sm:$0xff]  ;;  %v1783_v43 = vld [vmem:[#allocation5] sm:$0xff]  ;;  %v1779_v10 = vpack.c.bf16 %v2826_v45, %v2780_v20  ;;  %v1780_v11 = vpack.c.bf16 %v2918_v50, %v2872_v36  ;;  %v1781_v13 = vpack.c.bf16 %v3074_v0, %v2962_v51  ;;  %v1782_v23 = vpack.c.bf16 %v1764_v59, %v3115_v25  ;;  %s2412_s5 = smov [#allocation16]  }
 0x9d6   :  { %v1786_v9 = vld [vmem:[#allocation5 + $0x18] sm:$0xff]  ;;  %1811 = vmatprep.subr.bf16.mxu0 %v1784_v34  ;;  %v1785_v2 = vld [vmem:[#allocation5 + $0x10] sm:$0xff]  ;;  %v1788_v6 = vld [vmem:[#allocation5 + $0x28] sm:$0xff]  ;;  %s1918_s14 = sshll.u32 %s2412_s5, 4  ;;  %s1919_s14 = int_to_ptr.vmem [resolvable:$true] %s1918_s14 }
 0x9d7   :  { %1812 = vmatpush1.bf16.msra.mxu0 %v1783_v43  ;;  %v1787_v28 = vld [vmem:[#allocation5 + $0x20] sm:$0xff]  ;;  %v1790_v46 = vld [vmem:[#allocation5 + $0x38] sm:$0xff]  ;;  %v1789_v30 = vld [vmem:[#allocation5 + $0x30] sm:$0xff]  ;;  %s2314_s21 = scalar_lea.vmem %s1919_s14, 128  ;;  %p2319_p5 = scmp.lt.s32.totalorder %s1919_s14, %s1919_s14 }
 0x9d8   :  { %1813 = vmatprep.subr.bf16.mxu0 %v1786_v9  ;;  %v1792_v4 = vld [vmem:[#allocation5 + $0x48] sm:$0xff]  ;;  %v1791_v22 = vld [vmem:[#allocation5 + $0x40] sm:$0xff]  ;;  %v1794_v63 = vld [vmem:[#allocation5 + $0x58] sm:$0xff]  ;;  %p2315_p4 = scmp.ne.s32.totalorder %s1919_s14, %s2314_s21  ;;  %p2320_p6 = scmp.lt.s32.totalorder %s2314_s21, %s2314_s21 }
 0x9d9   :  { %v1793_v62 = vld [vmem:[#allocation5 + $0x50] sm:$0xff]  ;;  %v1796_v1 = vld [vmem:[#allocation5 + $0x68] sm:$0xff]  ;;  %v1795_v5 = vld [vmem:[#allocation5 + $0x60] sm:$0xff] }
 0x9da   :  { %v1798_v7 = vld [vmem:[#allocation5 + $0x78] sm:$0xff]  ;;  %v1797_v8 = vld [vmem:[#allocation5 + $0x70] sm:$0xff]  ;;  %p2321_p7 = por %p2320_p6, %p2319_p5 }
 0x9db   :  { %1814 = vmatpush1.bf16.msra.mxu0 %v1785_v2 }
 0x9dc   :  { %1815 = vmatprep.subr.bf16.mxu0 %v1788_v6  ;;  %p2322_p8 = pnand %p2321_p7, %p2315_p4 }
 0x9df   :  { %1816 = vmatpush1.bf16.msra.mxu0 %v1787_v28 }
 0x9e0   :  { %1817 = vmatprep.subr.bf16.mxu0 %v1790_v46 }
 0x9e3   :  { %1818 = vmatpush1.bf16.msra.mxu0 %v1789_v30 }
 0x9e4   :  { %1819 = vmatprep.subr.bf16.mxu0 %v1792_v4 }
 0x9e7   :  { %1820 = vmatpush1.bf16.msra.mxu0 %v1791_v22 }
 0x9e8   :  { %1821 = vmatprep.subr.bf16.mxu0 %v1794_v63 }
 0x9eb   :  { %1822 = vmatpush1.bf16.msra.mxu0 %v1793_v62 }
 0x9ec   :  { %1823 = vmatprep.subr.bf16.mxu0 %v1796_v1 }
 0x9ef   :  { %1824 = vmatpush1.bf16.msra.mxu0 %v1795_v5 }
 0x9f0   :  { %1825 = vmatprep.subr.bf16.mxu0 %v1798_v7 }
 0x9f3   :  { %1826 = vmatpush1.bf16.msra.mxu0 %v1797_v8 }
 0x9f6   :  { %1844 = vmatmul.mubr.bf16.vlgmr.msra.gmra.mrb[32].mxu0 %v1779_v10 }
 0x9f7   :  { %1853 = vmatprep.mubr.bf16.mxu0 %v3215_v14 }
 0x9fe   :  { %1854 = vmatmul.mubr.bf16.gmra.mrb[36].mxu0 %v1780_v11 }
 0x9ff   :  { %1863 = vmatprep.mubr.bf16.mxu0 %v3215_v14 }
 0xa06   :  { %1864 = vmatmul.mubr.bf16.gmra.mrb[40].mxu0 %v1781_v13 }
 0xa07   :  { %1873 = vmatprep.mubr.bf16.mxu0 %v3215_v14 }
 0xa0e   :  { %1874 = vmatmul.mubr.bf16.gmra.mrb[44].mxu0 %v1782_v23 }
 0xa0f   :  { %2325 = shalt.err (!%p2322_p8)
}
 0xa10   :  { %s2326_s25 = scalar_lea.hbm %s3189_s9, 128 }
 0xa11   :  { %p2327_p9 = scmp.ne.s32.totalorder %s3189_s9, %s2326_s25  ;;  %p2330_p10 = scmp.lt.u32.totalorder %s2326_s25, %s3189_s9 }
 0xa13   :  { %p2332_p11 = pnand %p2330_p10, %p2327_p9 }
 0xa15   :  { %2335 = shalt.err (!%p2332_p11)
}
 0xa16   :  { %1921 = dma.vmem_to_hbm [thread:$0]  %s1919_s14, 128, %s3189_s9, [#allocation17]  }
 0xa17   :  { %s2413_s0 = smov [#allocation18]  }
 0xa18   :  { %s1928_s16 = sshll.u32 %s2413_s0, 4  ;;  %s1929_s16 = int_to_ptr.vmem [resolvable:$true] %s1928_s16 }
 0xa19   :  { %s2336_s30 = scalar_lea.vmem %s1929_s16, 128  ;;  %p2341_p13 = scmp.lt.s32.totalorder %s1929_s16, %s1929_s16 }
 0xa1a   :  { %p2337_p12 = scmp.ne.s32.totalorder %s1929_s16, %s2336_s30  ;;  %p2342_p0 = scmp.lt.s32.totalorder %s2336_s30, %s2336_s30 }
 0xa1c   :  { %p2343_p1 = por %p2342_p0, %p2341_p13 }
 0xa1e   :  { %p2344_p2 = pnand %p2343_p1, %p2337_p12 }
 0xa20   :  { %2347 = shalt.err (!%p2344_p2)
}
 0xa21   :  { %s2348_s13 = scalar_lea.hbm %s3190_s10, 128 }
 0xa22   :  { %p2349_p3 = scmp.ne.s32.totalorder %s3190_s10, %s2348_s13  ;;  %p2352_p4 = scmp.lt.u32.totalorder %s2348_s13, %s3190_s10 }
 0xa24   :  { %p2354_p5 = pnand %p2352_p4, %p2349_p3 }
 0xa26   :  { %2357 = shalt.err (!%p2354_p5)
}
 0xa27   :  { %1931 = dma.vmem_to_hbm [thread:$0]  %s1929_s16, 128, %s3190_s10, [#allocation17]   ;;  %v1799_v14 = vld [vmem:[%s3187_s7] sm:$0x3] }
 0xa28   :  { %v3233_v20 = vld [vmem:[#allocation30_spill] sm:$0xff]  ;;  %s2414_s7 = smov [#allocation15]  }
 0xa29   :  { %v3234_v45 = vsub.s32 0, %v3233_v20  ;;  %v3235_v50 = vsub.s32 1, %v3233_v20  ;;  %s1905_s10 = sshll.u32 %s2414_s7, 4  ;;  %s1906_s10 = int_to_ptr.vmem [resolvable:$true] %s1905_s10 }
 0xa2a   :  { %s2358_s5 = scalar_lea.vmem %s1906_s10, 2048  ;;  %p2363_p7 = scmp.lt.s32.totalorder %s1906_s10, %s1906_s10 }
 0xa2b   :  { %v1804_v36 = vrot.slane %v1799_v14, %v3234_v45  ;;  %v1808_v51 = vrot.slane %v1799_v14, %v3235_v50  ;;  %p2359_p6 = scmp.ne.s32.totalorder %s1906_s10, %s2358_s5  ;;  %p2364_p8 = scmp.lt.s32.totalorder %s2358_s5, %s2358_s5 }
 0xa2d   :  { %p2365_p9 = por %p2364_p8, %p2363_p7 }
 0xa2f   :  { %p2366_p10 = pnand %p2365_p9, %p2359_p6 }
 0xac9   :  { %v1845_v0 = vpop.f32.mrb[32].mxu0 }
 0xaca   :  { %v1846_v54 = vadd.f32 %v1845_v0, %v1804_v36  ;;  %v1847_v25 = vpop.f32.mrb[33].mxu0 }
 0xacb   :  { %v1848_v27 = vadd.f32 %v1847_v25, %v1808_v51  ;;  %v1849_v29 = vpop.f32.mrb[34].mxu0 }
 0xacc   :  { %1884 = vst [vmem:[#allocation15] sm:$0xff] %v1846_v54  ;;  %v1850_v31 = vadd.f32 %v1849_v29, %v1804_v36  ;;  %v1851_v33 = vpop.f32.mrb[35].mxu0 }
 0xacd   :  { %1885 = vst [vmem:[#allocation15 + $0x8] sm:$0xff] %v1848_v27  ;;  %v1852_v35 = vadd.f32 %v1851_v33, %v1808_v51 }
 0xace   :  { %1886 = vst [vmem:[#allocation15 + $0x10] sm:$0xff] %v1850_v31 }
 0xacf   :  { %1887 = vst [vmem:[#allocation15 + $0x18] sm:$0xff] %v1852_v35 }
 0xad1   :  { %v1855_v37 = vpop.f32.mrb[36].mxu0 }
 0xad2   :  { %v1856_v42 = vadd.f32 %v1855_v37, %v1804_v36  ;;  %v1857_v44 = vpop.f32.mrb[37].mxu0 }
 0xad3   :  { %v1858_v48 = vadd.f32 %v1857_v44, %v1808_v51  ;;  %v1859_v52 = vpop.f32.mrb[38].mxu0 }
 0xad4   :  { %1888 = vst [vmem:[#allocation15 + $0x20] sm:$0xff] %v1856_v42  ;;  %v1860_v56 = vadd.f32 %v1859_v52, %v1804_v36  ;;  %v1861_v18 = vpop.f32.mrb[39].mxu0 }
 0xad5   :  { %1889 = vst [vmem:[#allocation15 + $0x28] sm:$0xff] %v1858_v48  ;;  %v1862_v49 = vadd.f32 %v1861_v18, %v1808_v51 }
 0xad6   :  { %1890 = vst [vmem:[#allocation15 + $0x30] sm:$0xff] %v1860_v56 }
 0xad7   :  { %1891 = vst [vmem:[#allocation15 + $0x38] sm:$0xff] %v1862_v49 }
 0xad9   :  { %v1865_v61 = vpop.f32.mrb[40].mxu0 }
 0xada   :  { %v1866_v32 = vadd.f32 %v1865_v61, %v1804_v36  ;;  %v1867_v40 = vpop.f32.mrb[41].mxu0 }
 0xadb   :  { %v1868_v15 = vadd.f32 %v1867_v40, %v1808_v51  ;;  %v1869_v17 = vpop.f32.mrb[42].mxu0 }
 0xadc   :  { %1892 = vst [vmem:[#allocation15 + $0x40] sm:$0xff] %v1866_v32  ;;  %v1870_v41 = vadd.f32 %v1869_v17, %v1804_v36  ;;  %v1871_v16 = vpop.f32.mrb[43].mxu0 }
 0xadd   :  { %1893 = vst [vmem:[#allocation15 + $0x48] sm:$0xff] %v1868_v15  ;;  %v1872_v19 = vadd.f32 %v1871_v16, %v1808_v51 }
 0xade   :  { %1894 = vst [vmem:[#allocation15 + $0x50] sm:$0xff] %v1870_v41 }
 0xadf   :  { %1895 = vst [vmem:[#allocation15 + $0x58] sm:$0xff] %v1872_v19 }
 0xae1   :  { %v1875_v21 = vpop.f32.mrb[44].mxu0 }
 0xae2   :  { %v1876_v38 = vadd.f32 %v1875_v21, %v1804_v36  ;;  %v1877_v26 = vpop.f32.mrb[45].mxu0 }
 0xae3   :  { %v1878_v58 = vadd.f32 %v1877_v26, %v1808_v51  ;;  %v1879_v39 = vpop.f32.mrb[46].mxu0 }
 0xae4   :  { %1896 = vst [vmem:[#allocation15 + $0x60] sm:$0xff] %v1876_v38  ;;  %v1880_v47 = vadd.f32 %v1879_v39, %v1804_v36  ;;  %v1881_v60 = vpop.f32.mrb[47].mxu0 }
 0xae5   :  { %1897 = vst [vmem:[#allocation15 + $0x68] sm:$0xff] %v1878_v58  ;;  %v1882_v53 = vadd.f32 %v1881_v60, %v1808_v51 }
 0xae6   :  { %1898 = vst [vmem:[#allocation15 + $0x70] sm:$0xff] %v1880_v47 }
 0xae7   :  { %1899 = vst [vmem:[#allocation15 + $0x78] sm:$0xff] %v1882_v53 }
 0xae8   :  { %2369 = shalt.err (!%p2366_p10)
}
 0xae9   :  { %s2370_s23 = scalar_lea.hbm %s3188_s8, 2048 }
 0xaea   :  { %p2371_p11 = scmp.ne.s32.totalorder %s3188_s8, %s2370_s23  ;;  %p2374_p12 = scmp.lt.u32.totalorder %s2370_s23, %s3188_s8 }
 0xaec   :  { %p2376_p13 = pnand %p2374_p12, %p2371_p11 }
 0xaee   :  { %2379 = shalt.err (!%p2376_p13)
}
 0xaef   :  { %1911 = dma.vmem_to_hbm [thread:$0]  %s1906_s10, 2048, %s3188_s8, [#allocation9], %s2400_s2, %s2400_s2, %s2401_s20  }
 0xaf0   :  { %2390 = dma.done.wait [#allocation9], 2048  }
 0xaf1   :  { %2391 = vsyncadd [#allocation9], 4294965248 }
 0xaf2   :  { %2392 = dma.done.wait [#allocation17], 256  }
 0xaf3   :  { %2393 = vsyncadd [#allocation17], 4294967040 }
 0xaf4   :  { %1941 = vsyncpa [#allocation8], 1 }
 0xaf5   :  { %1942 = vsyncpa [#allocation11], 1 }
 0xaf6   :  { %1943 = vsyncpa [#allocation14], 1 }
 0xaf7   :  { %1944 = vsyncpa [#allocation9], 1 }
 0xaf8   :  { %1945 = vsyncpa [#allocation17], 1 }
 0xaf9   :  { %1946 = vsyncmov [#allocation6] }
 0xafc   :  { %s1947_s22 = vpop.sfrf %1946 }
 0xafd   :  { %p2023_p0 = scmp.ne.s32.totalorder %s1947_s22, 0 }
 0xaff   :  { %1951 = shalt.err (%p2023_p0)  }
 0xb00   :  { %1953 = vsyncmov [#allocation6 + $0x1] }
 0xb03   :  { %s1954_s29 = vpop.sfrf %1953 }
 0xb04   :  { %p2024_p1 = scmp.ne.s32.totalorder %s1954_s29, 0 }
 0xb06   :  { %1958 = shalt.err (%p2024_p1)  }

</bundles_post_ra>
